<compile_context>
chip_gen: v7x
topology: tpu7x:2x2x1
jax: 0.10.0
libtpu: 0.0.40
codegen_flags: <defaults>
</compile_context>

<pallas_src>
import math
import functools

import jax
import jax.numpy as jnp
from jax.experimental import pallas as pl
from jax.experimental.pallas import tpu as pltpu


CFG = dict(vocab=50, hidden=32, n_heads=4, n_layers=2, intermediate=64,
           max_pos=16, type_vocab=2, n_heads_out=3, n_classes=3)
LN_EPS = 1e-12


# ----------------------------------------------------------------------------
# Single fused Pallas kernel
# ----------------------------------------------------------------------------

def _bert_kernel(ids_ref, amask_ref, we_ref, pe_ref, embln_ref,
                 wqkv_ref, wo_ref, w1_ref, w2_ref, vecs_ref, head_ref,
                 out_ref, *, B, S, H, nH, I, L, eps):
    BS = B * S
    Dh = H // nH
    scale = 1.0 / math.sqrt(Dh)
    f32 = jnp.float32

    def layer_norm(t, g, b):
        mu = jnp.mean(t, axis=-1, keepdims=True)
        var = jnp.mean(jnp.square(t - mu), axis=-1, keepdims=True)
        return (t - mu) * jax.lax.rsqrt(var + eps) * g + b

    # --- token embedding gather as a one-hot MXU matmul ----------------------
    ids = ids_ref[...]                                           # (BS, 1) int32
    vocab = we_ref.shape[0]
    onehot = jnp.where(
        ids == jax.lax.broadcasted_iota(jnp.int32, (BS, vocab), 1), 1.0, 0.0)
    emb = jnp.dot(onehot, we_ref[...], preferred_element_type=f32)   # (BS, H)

    # position embedding already has the token-type-0 embedding folded in
    pe = pe_ref[:S, :]                                           # (S, H)
    emb = emb + jnp.concatenate([pe] * B, axis=0)                # tile over batch
    x = layer_norm(emb, embln_ref[0:1, :], embln_ref[1:2, :])    # (BS, H)

    # --- additive attention mask: block-diagonal (batch) + padding -----------
    # Built from static lane slices / concats (no integer division needed).
    amask = amask_ref[...]                                       # (1, BS) 1/0
    zero_blk = jnp.zeros((1, S), f32)
    rows = []
    for bi in range(B):
        pieces = [amask[:, bj * S:(bj + 1) * S] if bj == bi else zero_blk
                  for bj in range(B)]
        valid_bi = jnp.concatenate(pieces, axis=1)               # (1, BS)
        row_mask = jnp.where(valid_bi > 0.5, 0.0, -1e9)          # (1, BS)
        rows.append(jnp.broadcast_to(row_mask, (S, BS)))
    add_mask = jnp.concatenate(rows, axis=0)                     # (BS, BS)

    # --- encoder stack (static unroll over layers / heads) -------------------
    for l in range(L):
        vecs_l = vecs_ref[l]                                     # (8, 3H)
        bqkv = vecs_l[0:1, :]                                    # (1, 3H)
        bo   = vecs_l[1:2, :H]
        ln1g = vecs_l[2:3, :H]
        ln1b = vecs_l[3:4, :H]
        b1   = vecs_l[4:5, :I]
        b2   = vecs_l[5:6, :H]
        ln2g = vecs_l[6:7, :H]
        ln2b = vecs_l[7:8, :H]

        # fused Q|K|V projection: one (BS, H) @ (H, 3H) matmul
        qkv = jnp.dot(x, wqkv_ref[l], preferred_element_type=f32) + bqkv

        ctx_heads = []
        for h in range(nH):
            q = qkv[:, h * Dh:(h + 1) * Dh]                      # (BS, Dh)
            k = qkv[:, H + h * Dh:H + (h + 1) * Dh]
            v = qkv[:, 2 * H + h * Dh:2 * H + (h + 1) * Dh]
            # contract last dims -> no explicit K transpose
            s = jax.lax.dot_general(q, k, (((1,), (1,)), ((), ())),
                                    preferred_element_type=f32) * scale
            s = s + add_mask                                     # (BS, BS)
            s = s - jnp.max(s, axis=-1, keepdims=True)
            p = jnp.exp(s)
            p = p * pl.reciprocal(jnp.sum(p, axis=-1, keepdims=True),
                                  approx=True)
            ctx_heads.append(jnp.dot(p, v, preferred_element_type=f32))
        ctx = jnp.concatenate(ctx_heads, axis=-1)                # (BS, H)

        attn_out = jnp.dot(ctx, wo_ref[l], preferred_element_type=f32) + bo
        x = layer_norm(attn_out + x, ln1g, ln1b)

        hmid = jnp.dot(x, w1_ref[l], preferred_element_type=f32) + b1
        # TODO(synk): HF BERT default is the exact erf GELU; tanh approximation
        # is used here since erf is not guaranteed to lower in Mosaic.
        hmid = jax.nn.gelu(hmid, approximate=True)
        ffn = jnp.dot(hmid, w2_ref[l], preferred_element_type=f32) + b2
        x = layer_norm(ffn + x, ln2g, ln2b)

    # --- CLS rows -> single merged (H, 9) classifier matmul, one store -------
    # nn.Dropout(p=0.1) is the identity at inference (eval mode).
    cls = jnp.concatenate([x[b * S:b * S + 1, :] for b in range(B)], axis=0)
    logits = jnp.dot(cls, head_ref[...][:H, :],
                     preferred_element_type=f32) + head_ref[...][H:H + 1, :]
    out_ref[...] = logits.astype(out_ref.dtype)


def _full_spec(shape):
    # whole-array single block (no grid): index_map takes no args
    return pl.BlockSpec(shape, lambda shape=shape: (0,) * len(shape))


def bert_forward(packed, source_padded, attention_mask, cfg=CFG):
    """source_padded: int32 (B, S) token ids; attention_mask: (B, S) 1/0."""
    B, S = source_padded.shape
    H, nH, L = cfg["hidden"], cfg["n_heads"], cfg["n_layers"]
    I, n_cls, n_ho = cfg["intermediate"], cfg["n_classes"], cfg["n_heads_out"]
    C = n_cls * n_ho

    # the only "glue" left: metadata reshapes / dtype casts of the two inputs
    ids = source_padded.reshape(B * S, 1).astype(jnp.int32)
    amask = attention_mask.reshape(1, B * S).astype(jnp.float32)

    operands = (ids, amask,
                packed["word_emb"], packed["pos_emb"], packed["emb_ln"],
                packed["wqkv"], packed["wo"], packed["w1"], packed["w2"],
                packed["vecs"], packed["head"])

    kern = functools.partial(_bert_kernel, B=B, S=S, H=H, nH=nH, I=I, L=L,
                             eps=LN_EPS)
    logits = pl.pallas_call(
        kern,
        out_shape=jax.ShapeDtypeStruct((B, C), jnp.float32),
        in_specs=[_full_spec(o.shape) for o in operands],
        out_specs=_full_spec((B, C)),
    )(*operands)

    # split the (B, 9) lane-merged head output into the 3 (B, 3) head outputs
    return [logits[:, i * n_cls:(i + 1) * n_cls] for i in range(n_ho)]


# ----------------------------------------------------------------------------
# Parameter construction / packing (one-time, outside the forward path)
# ----------------------------------------------------------------------------

def init_params(key, cfg=CFG):
    H, I = cfg["hidden"], cfg["intermediate"]

    def nrm(k, shape):
        return 0.02 * jax.random.normal(k, shape, dtype=jnp.float32)

    keys = iter(jax.random.split(key, 64))
    p = {
        "word_emb": nrm(next(keys), (cfg["vocab"], H)),
        "pos_emb": nrm(next(keys), (cfg["max_pos"], H)),
        "type_emb": nrm(next(keys), (cfg["type_vocab"], H)),
        "emb_ln_g": jnp.ones((1, H), jnp.float32),
        "emb_ln_b": jnp.zeros((1, H), jnp.float32),
        "layers": [],
        "head_w": [nrm(next(keys), (H, cfg["n_classes"]))
                   for _ in range(cfg["n_heads_out"])],
        "head_b": [jnp.zeros((1, cfg["n_classes"]), jnp.float32)
                   for _ in range(cfg["n_heads_out"])],
    }
    for _ in range(cfg["n_layers"]):
        lp = {
            "wq": nrm(next(keys), (H, H)), "bq": jnp.zeros((1, H), jnp.float32),
            "wk": nrm(next(keys), (H, H)), "bk": jnp.zeros((1, H), jnp.float32),
            "wv": nrm(next(keys), (H, H)), "bv": jnp.zeros((1, H), jnp.float32),
            "wo": nrm(next(keys), (H, H)), "bo": jnp.zeros((1, H), jnp.float32),
            "ln1_g": jnp.ones((1, H), jnp.float32),
            "ln1_b": jnp.zeros((1, H), jnp.float32),
            "w1": nrm(next(keys), (H, I)), "b1": jnp.zeros((1, I), jnp.float32),
            "w2": nrm(next(keys), (I, H)), "b2": jnp.zeros((1, H), jnp.float32),
            "ln2_g": jnp.ones((1, H), jnp.float32),
            "ln2_b": jnp.zeros((1, H), jnp.float32),
        }
        p["layers"].append(lp)
    return p


def pack_params(p, cfg=CFG):
    """Pack weights for the fused kernel:
      * Q|K|V concatenated, per-layer matrices stacked along a layer axis.
      * 12 per-layer bias/LN vectors packed into one (L, 8, 3H) array.
      * token-type-0 embedding folded into the position table.
      * 3 classifier heads merged into one (H+1, 9) weight (last row = bias).
    """
    H, I = cfg["hidden"], cfg["intermediate"]
    W = 3 * H
    layers = p["layers"]

    def pad_to(v, n):                       # (1, k) -> (1, n)
        return jnp.pad(v, ((0, 0), (0, n - v.shape[1])))

    vec_rows = []
    for lp in layers:
        rows = [jnp.concatenate([lp["bq"], lp["bk"], lp["bv"]], axis=1),
                pad_to(lp["bo"], W), pad_to(lp["ln1_g"], W),
                pad_to(lp["ln1_b"], W), pad_to(lp["b1"], W),
                pad_to(lp["b2"], W), pad_to(lp["ln2_g"], W),
                pad_to(lp["ln2_b"], W)]
        vec_rows.append(jnp.concatenate(rows, axis=0))           # (8, 3H)

    return {
        "word_emb": p["word_emb"],
        # TODO(synk): token_type_ids hard-coded to 0 (matches the reference's
        # usage, where only input ids and attention_mask are supplied).
        "pos_emb": p["pos_emb"] + p["type_emb"][0:1, :],
        "emb_ln": jnp.concatenate([p["emb_ln_g"], p["emb_ln_b"]], axis=0),
        "wqkv": jnp.stack([jnp.concatenate([lp["wq"], lp["wk"], lp["wv"]],
                                           axis=1) for lp in layers]),
        "wo": jnp.stack([lp["wo"] for lp in layers]),
        "w1": jnp.stack([lp["w1"] for lp in layers]),
        "w2": jnp.stack([lp["w2"] for lp in layers]),
        "vecs": jnp.stack(vec_rows),                             # (L, 8, 3H)
        "head": jnp.concatenate(
            [jnp.concatenate(p["head_w"], axis=1),               # (H, 9)
             jnp.concatenate(p["head_b"], axis=1)], axis=0),     # (H+1, 9)
    }


# ----------------------------------------------------------------------------

if __name__ == "__main__":
    key = jax.random.PRNGKey(0)
    k_param, k_tok = jax.random.split(key, 2)

    B, S = 2, 8
    params = pack_params(init_params(k_param))

    source_padded = jax.random.randint(k_tok, (B, S), 0, CFG["vocab"],
                                       dtype=jnp.int32)
    # mask out the last 2 tokens of the second example (padding)
    attention_mask = jnp.ones((B, S), jnp.float32).at[1, -2:].set(0.0)

    fwd = jax.jit(bert_forward)
    outs = fwd(params, source_padded, attention_mask)
    outs = [jax.block_until_ready(o) for o in outs]

    assert len(outs) == 3
    for o in outs:
        assert o.shape == (B, 3) and o.dtype == jnp.float32
        assert bool(jnp.all(jnp.isfinite(o)))

    print("KERNEL_OK")
</pallas_src>

<mosaic_0001>
module attributes {stable_mosaic.version = 11 : i64} {
  func.func @_bert_kernel(%arg0: memref<16x1xi32, #tpu.memory_space<vmem>>, %arg1: memref<1x16xf32, #tpu.memory_space<vmem>>, %arg2: memref<50x32xf32, #tpu.memory_space<vmem>>, %arg3: memref<16x32xf32, #tpu.memory_space<vmem>>, %arg4: memref<2x32xf32, #tpu.memory_space<vmem>>, %arg5: memref<2x32x96xf32, #tpu.memory_space<vmem>>, %arg6: memref<2x32x32xf32, #tpu.memory_space<vmem>>, %arg7: memref<2x32x64xf32, #tpu.memory_space<vmem>>, %arg8: memref<2x64x32xf32, #tpu.memory_space<vmem>>, %arg9: memref<2x8x96xf32, #tpu.memory_space<vmem>>, %arg10: memref<33x9xf32, #tpu.memory_space<vmem>>, %arg11: memref<2x9xf32, #tpu.memory_space<vmem>>) attributes {dimension_semantics = [], scalar_prefetch = 0 : i64, scratch_operands = 0 : i64, tpu.core_type = #tpu.core_type<tc>} {
    %c0 = arith.constant 0 : index
    %c0_0 = arith.constant 0 : index
    %0 = vector.load %arg0[%c0, %c0_0] : memref<16x1xi32, #tpu.memory_space<vmem>>, vector<16x1xi32>
    %1 = tpu.iota {dimensions = array<i32: 1>} : vector<16x50xi32>
    %2 = vector.broadcast %0 : vector<16x1xi32> to vector<16x50xi32>
    %3 = arith.cmpi eq, %2, %1 : vector<16x50xi32>
    %cst = arith.constant 1.000000e+00 : f32
    %cst_1 = arith.constant 0.000000e+00 : f32
    %4 = vector.broadcast %cst : f32 to vector<16x50xf32>
    %5 = vector.broadcast %cst_1 : f32 to vector<16x50xf32>
    %6 = arith.select %3, %4, %5 : vector<16x50xi1>, vector<16x50xf32>
    %c0_2 = arith.constant 0 : index
    %c0_3 = arith.constant 0 : index
    %7 = vector.load %arg2[%c0_2, %c0_3] : memref<50x32xf32, #tpu.memory_space<vmem>>, vector<50x32xf32>
    %cst_4 = arith.constant dense<0.000000e+00> : vector<16x32xf32>
    %8 = tpu.matmul %6, %7, %cst_4 {dimension_numbers = #tpu.dot_dimension_numbers<[1], [0], [0], [1], [0, 0, 1, 1], [], []>} : vector<16x50xf32>, vector<50x32xf32>, vector<16x32xf32> -> vector<16x32xf32>
    %c0_5 = arith.constant 0 : index
    %c0_6 = arith.constant 0 : index
    %9 = vector.load %arg3[%c0_5, %c0_6] : memref<16x32xf32, #tpu.memory_space<vmem>>, vector<8x32xf32>
    %10 = tpu.concatenate %9, %9 in 0 : vector<8x32xf32>, vector<8x32xf32> -> vector<16x32xf32>
    %11 = arith.addf %8, %10 : vector<16x32xf32>
    %c0_7 = arith.constant 0 : index
    %c0_8 = arith.constant 0 : index
    %12 = vector.load %arg4[%c0_7, %c0_8] : memref<2x32xf32, #tpu.memory_space<vmem>>, vector<1x32xf32>
    %c1 = arith.constant 1 : index
    %c0_9 = arith.constant 0 : index
    %13 = vector.load %arg4[%c1, %c0_9] : memref<2x32xf32, #tpu.memory_space<vmem>>, vector<1x32xf32>
    %cst_10 = arith.constant dense<0.000000e+00> : vector<16xf32>
    %14 = vector.multi_reduction <add>, %11, %cst_10 [1] : vector<16x32xf32> to vector<16xf32>
    %15 = vector.shape_cast %14 : vector<16xf32> to vector<16x1xf32>
    %cst_11 = arith.constant 3.200000e+01 : f32
    %16 = vector.broadcast %cst_11 : f32 to vector<16x1xf32>
    %17 = arith.divf %15, %16 : vector<16x1xf32>
    %18 = vector.broadcast %17 : vector<16x1xf32> to vector<16x32xf32>
    %19 = arith.subf %11, %18 : vector<16x32xf32>
    %20 = arith.mulf %19, %19 : vector<16x32xf32>
    %cst_12 = arith.constant dense<0.000000e+00> : vector<16xf32>
    %21 = vector.multi_reduction <add>, %20, %cst_12 [1] : vector<16x32xf32> to vector<16xf32>
    %22 = vector.shape_cast %21 : vector<16xf32> to vector<16x1xf32>
    %cst_13 = arith.constant 3.200000e+01 : f32
    %23 = vector.broadcast %cst_13 : f32 to vector<16x1xf32>
    %24 = arith.divf %22, %23 : vector<16x1xf32>
    %25 = vector.broadcast %17 : vector<16x1xf32> to vector<16x32xf32>
    %26 = arith.subf %11, %25 : vector<16x32xf32>
    %cst_14 = arith.constant 9.99999996E-13 : f32
    %27 = vector.broadcast %cst_14 : f32 to vector<16x1xf32>
    %28 = arith.addf %24, %27 : vector<16x1xf32>
    %29 = math.rsqrt %28 : vector<16x1xf32>
    %30 = vector.broadcast %29 : vector<16x1xf32> to vector<16x32xf32>
    %31 = arith.mulf %26, %30 : vector<16x32xf32>
    %32 = vector.broadcast %12 : vector<1x32xf32> to vector<16x32xf32>
    %33 = arith.mulf %31, %32 : vector<16x32xf32>
    %34 = vector.broadcast %13 : vector<1x32xf32> to vector<16x32xf32>
    %35 = arith.addf %33, %34 : vector<16x32xf32>
    %c0_15 = arith.constant 0 : index
    %c0_16 = arith.constant 0 : index
    %36 = vector.load %arg1[%c0_15, %c0_16] : memref<1x16xf32, #tpu.memory_space<vmem>>, vector<1x16xf32>
    %cst_17 = arith.constant 0.000000e+00 : f32
    %37 = vector.broadcast %cst_17 : f32 to vector<1x8xf32>
    %38 = vector.extract_strided_slice %36 {offsets = [0, 0], sizes = [1, 8], strides = [1, 1]} : vector<1x16xf32> to vector<1x8xf32>
    %39 = tpu.concatenate %38, %37 in 1 : vector<1x8xf32>, vector<1x8xf32> -> vector<1x16xf32>
    %cst_18 = arith.constant 5.000000e-01 : f32
    %40 = vector.broadcast %cst_18 : f32 to vector<1x16xf32>
    %41 = arith.cmpf ogt, %39, %40 : vector<1x16xf32>
    %cst_19 = arith.constant 0.000000e+00 : f32
    %cst_20 = arith.constant -1.000000e+09 : f32
    %42 = vector.broadcast %cst_19 : f32 to vector<1x16xf32>
    %43 = vector.broadcast %cst_20 : f32 to vector<1x16xf32>
    %44 = arith.select %41, %42, %43 : vector<1x16xi1>, vector<1x16xf32>
    %45 = vector.shape_cast %44 : vector<1x16xf32> to vector<1x16xf32>
    %46 = vector.broadcast %45 : vector<1x16xf32> to vector<8x16xf32>
    %47 = vector.extract_strided_slice %36 {offsets = [0, 8], sizes = [1, 8], strides = [1, 1]} : vector<1x16xf32> to vector<1x8xf32>
    %48 = tpu.concatenate %37, %47 in 1 : vector<1x8xf32>, vector<1x8xf32> -> vector<1x16xf32>
    %cst_21 = arith.constant 5.000000e-01 : f32
    %49 = vector.broadcast %cst_21 : f32 to vector<1x16xf32>
    %50 = arith.cmpf ogt, %48, %49 : vector<1x16xf32>
    %cst_22 = arith.constant 0.000000e+00 : f32
    %cst_23 = arith.constant -1.000000e+09 : f32
    %51 = vector.broadcast %cst_22 : f32 to vector<1x16xf32>
    %52 = vector.broadcast %cst_23 : f32 to vector<1x16xf32>
    %53 = arith.select %50, %51, %52 : vector<1x16xi1>, vector<1x16xf32>
    %54 = vector.shape_cast %53 : vector<1x16xf32> to vector<1x16xf32>
    %55 = vector.broadcast %54 : vector<1x16xf32> to vector<8x16xf32>
    %56 = tpu.concatenate %46, %55 in 0 : vector<8x16xf32>, vector<8x16xf32> -> vector<16x16xf32>
    %c0_24 = arith.constant 0 : index
    %c0_25 = arith.constant 0 : index
    %c0_26 = arith.constant 0 : index
    %57 = vector.load %arg9[%c0_24, %c0_25, %c0_26] : memref<2x8x96xf32, #tpu.memory_space<vmem>>, vector<1x8x96xf32>
    %58 = vector.shape_cast %57 : vector<1x8x96xf32> to vector<8x96xf32>
    %59 = vector.extract_strided_slice %58 {offsets = [0, 0], sizes = [1, 96], strides = [1, 1]} : vector<8x96xf32> to vector<1x96xf32>
    %60 = vector.extract_strided_slice %58 {offsets = [1, 0], sizes = [1, 32], strides = [1, 1]} : vector<8x96xf32> to vector<1x32xf32>
    %61 = vector.extract_strided_slice %58 {offsets = [2, 0], sizes = [1, 32], strides = [1, 1]} : vector<8x96xf32> to vector<1x32xf32>
    %62 = vector.extract_strided_slice %58 {offsets = [3, 0], sizes = [1, 32], strides = [1, 1]} : vector<8x96xf32> to vector<1x32xf32>
    %63 = vector.extract_strided_slice %58 {offsets = [4, 0], sizes = [1, 64], strides = [1, 1]} : vector<8x96xf32> to vector<1x64xf32>
    %64 = vector.extract_strided_slice %58 {offsets = [5, 0], sizes = [1, 32], strides = [1, 1]} : vector<8x96xf32> to vector<1x32xf32>
    %65 = vector.extract_strided_slice %58 {offsets = [6, 0], sizes = [1, 32], strides = [1, 1]} : vector<8x96xf32> to vector<1x32xf32>
    %66 = vector.extract_strided_slice %58 {offsets = [7, 0], sizes = [1, 32], strides = [1, 1]} : vector<8x96xf32> to vector<1x32xf32>
    %c0_27 = arith.constant 0 : index
    %c0_28 = arith.constant 0 : index
    %c0_29 = arith.constant 0 : index
    %67 = vector.load %arg5[%c0_27, %c0_28, %c0_29] : memref<2x32x96xf32, #tpu.memory_space<vmem>>, vector<1x32x96xf32>
    %68 = vector.shape_cast %67 : vector<1x32x96xf32> to vector<32x96xf32>
    %cst_30 = arith.constant dense<0.000000e+00> : vector<16x96xf32>
    %69 = tpu.matmul %35, %68, %cst_30 {dimension_numbers = #tpu.dot_dimension_numbers<[1], [0], [0], [1], [0, 0, 1, 1], [], []>} : vector<16x32xf32>, vector<32x96xf32>, vector<16x96xf32> -> vector<16x96xf32>
    %70 = vector.broadcast %59 : vector<1x96xf32> to vector<16x96xf32>
    %71 = arith.addf %69, %70 : vector<16x96xf32>
    %72 = vector.extract_strided_slice %71 {offsets = [0, 0], sizes = [16, 8], strides = [1, 1]} : vector<16x96xf32> to vector<16x8xf32>
    %73 = vector.extract_strided_slice %71 {offsets = [0, 32], sizes = [16, 8], strides = [1, 1]} : vector<16x96xf32> to vector<16x8xf32>
    %74 = vector.extract_strided_slice %71 {offsets = [0, 64], sizes = [16, 8], strides = [1, 1]} : vector<16x96xf32> to vector<16x8xf32>
    %cst_31 = arith.constant dense<0.000000e+00> : vector<16x16xf32>
    %75 = tpu.matmul %72, %73, %cst_31 {dimension_numbers = #tpu.dot_dimension_numbers<[1], [1], [0], [0], [0, 0, 1, 0], [], []>} : vector<16x8xf32>, vector<16x8xf32>, vector<16x16xf32> -> vector<16x16xf32>
    %cst_32 = arith.constant 0.353553385 : f32
    %76 = vector.broadcast %cst_32 : f32 to vector<16x16xf32>
    %77 = arith.mulf %75, %76 : vector<16x16xf32>
    %78 = arith.addf %77, %56 : vector<16x16xf32>
    %cst_33 = arith.constant dense<0xFF800000> : vector<16xf32>
    %79 = vector.multi_reduction <maximumf>, %78, %cst_33 [1] : vector<16x16xf32> to vector<16xf32>
    %80 = vector.shape_cast %79 : vector<16xf32> to vector<16x1xf32>
    %81 = vector.broadcast %80 : vector<16x1xf32> to vector<16x16xf32>
    %82 = arith.subf %78, %81 : vector<16x16xf32>
    %83 = math.exp %82 : vector<16x16xf32>
    %cst_34 = arith.constant dense<0.000000e+00> : vector<16xf32>
    %84 = vector.multi_reduction <add>, %83, %cst_34 [1] : vector<16x16xf32> to vector<16xf32>
    %85 = vector.shape_cast %84 : vector<16xf32> to vector<16x1xf32>
    %86 = tpu.reciprocal %85 {approx = true} : vector<16x1xf32> -> vector<16x1xf32>
    %87 = vector.broadcast %86 : vector<16x1xf32> to vector<16x16xf32>
    %88 = arith.mulf %83, %87 : vector<16x16xf32>
    %cst_35 = arith.constant dense<0.000000e+00> : vector<16x8xf32>
    %89 = tpu.matmul %88, %74, %cst_35 {dimension_numbers = #tpu.dot_dimension_numbers<[1], [0], [0], [1], [0, 0, 1, 1], [], []>} : vector<16x16xf32>, vector<16x8xf32>, vector<16x8xf32> -> vector<16x8xf32>
    %90 = vector.extract_strided_slice %71 {offsets = [0, 8], sizes = [16, 8], strides = [1, 1]} : vector<16x96xf32> to vector<16x8xf32>
    %91 = vector.extract_strided_slice %71 {offsets = [0, 40], sizes = [16, 8], strides = [1, 1]} : vector<16x96xf32> to vector<16x8xf32>
    %92 = vector.extract_strided_slice %71 {offsets = [0, 72], sizes = [16, 8], strides = [1, 1]} : vector<16x96xf32> to vector<16x8xf32>
    %cst_36 = arith.constant dense<0.000000e+00> : vector<16x16xf32>
    %93 = tpu.matmul %90, %91, %cst_36 {dimension_numbers = #tpu.dot_dimension_numbers<[1], [1], [0], [0], [0, 0, 1, 0], [], []>} : vector<16x8xf32>, vector<16x8xf32>, vector<16x16xf32> -> vector<16x16xf32>
    %cst_37 = arith.constant 0.353553385 : f32
    %94 = vector.broadcast %cst_37 : f32 to vector<16x16xf32>
    %95 = arith.mulf %93, %94 : vector<16x16xf32>
    %96 = arith.addf %95, %56 : vector<16x16xf32>
    %cst_38 = arith.constant dense<0xFF800000> : vector<16xf32>
    %97 = vector.multi_reduction <maximumf>, %96, %cst_38 [1] : vector<16x16xf32> to vector<16xf32>
    %98 = vector.shape_cast %97 : vector<16xf32> to vector<16x1xf32>
    %99 = vector.broadcast %98 : vector<16x1xf32> to vector<16x16xf32>
    %100 = arith.subf %96, %99 : vector<16x16xf32>
    %101 = math.exp %100 : vector<16x16xf32>
    %cst_39 = arith.constant dense<0.000000e+00> : vector<16xf32>
    %102 = vector.multi_reduction <add>, %101, %cst_39 [1] : vector<16x16xf32> to vector<16xf32>
    %103 = vector.shape_cast %102 : vector<16xf32> to vector<16x1xf32>
    %104 = tpu.reciprocal %103 {approx = true} : vector<16x1xf32> -> vector<16x1xf32>
    %105 = vector.broadcast %104 : vector<16x1xf32> to vector<16x16xf32>
    %106 = arith.mulf %101, %105 : vector<16x16xf32>
    %cst_40 = arith.constant dense<0.000000e+00> : vector<16x8xf32>
    %107 = tpu.matmul %106, %92, %cst_40 {dimension_numbers = #tpu.dot_dimension_numbers<[1], [0], [0], [1], [0, 0, 1, 1], [], []>} : vector<16x16xf32>, vector<16x8xf32>, vector<16x8xf32> -> vector<16x8xf32>
    %108 = vector.extract_strided_slice %71 {offsets = [0, 16], sizes = [16, 8], strides = [1, 1]} : vector<16x96xf32> to vector<16x8xf32>
    %109 = vector.extract_strided_slice %71 {offsets = [0, 48], sizes = [16, 8], strides = [1, 1]} : vector<16x96xf32> to vector<16x8xf32>
    %110 = vector.extract_strided_slice %71 {offsets = [0, 80], sizes = [16, 8], strides = [1, 1]} : vector<16x96xf32> to vector<16x8xf32>
    %cst_41 = arith.constant dense<0.000000e+00> : vector<16x16xf32>
    %111 = tpu.matmul %108, %109, %cst_41 {dimension_numbers = #tpu.dot_dimension_numbers<[1], [1], [0], [0], [0, 0, 1, 0], [], []>} : vector<16x8xf32>, vector<16x8xf32>, vector<16x16xf32> -> vector<16x16xf32>
    %cst_42 = arith.constant 0.353553385 : f32
    %112 = vector.broadcast %cst_42 : f32 to vector<16x16xf32>
    %113 = arith.mulf %111, %112 : vector<16x16xf32>
    %114 = arith.addf %113, %56 : vector<16x16xf32>
    %cst_43 = arith.constant dense<0xFF800000> : vector<16xf32>
    %115 = vector.multi_reduction <maximumf>, %114, %cst_43 [1] : vector<16x16xf32> to vector<16xf32>
    %116 = vector.shape_cast %115 : vector<16xf32> to vector<16x1xf32>
    %117 = vector.broadcast %116 : vector<16x1xf32> to vector<16x16xf32>
    %118 = arith.subf %114, %117 : vector<16x16xf32>
    %119 = math.exp %118 : vector<16x16xf32>
    %cst_44 = arith.constant dense<0.000000e+00> : vector<16xf32>
    %120 = vector.multi_reduction <add>, %119, %cst_44 [1] : vector<16x16xf32> to vector<16xf32>
    %121 = vector.shape_cast %120 : vector<16xf32> to vector<16x1xf32>
    %122 = tpu.reciprocal %121 {approx = true} : vector<16x1xf32> -> vector<16x1xf32>
    %123 = vector.broadcast %122 : vector<16x1xf32> to vector<16x16xf32>
    %124 = arith.mulf %119, %123 : vector<16x16xf32>
    %cst_45 = arith.constant dense<0.000000e+00> : vector<16x8xf32>
    %125 = tpu.matmul %124, %110, %cst_45 {dimension_numbers = #tpu.dot_dimension_numbers<[1], [0], [0], [1], [0, 0, 1, 1], [], []>} : vector<16x16xf32>, vector<16x8xf32>, vector<16x8xf32> -> vector<16x8xf32>
    %126 = vector.extract_strided_slice %71 {offsets = [0, 24], sizes = [16, 8], strides = [1, 1]} : vector<16x96xf32> to vector<16x8xf32>
    %127 = vector.extract_strided_slice %71 {offsets = [0, 56], sizes = [16, 8], strides = [1, 1]} : vector<16x96xf32> to vector<16x8xf32>
    %128 = vector.extract_strided_slice %71 {offsets = [0, 88], sizes = [16, 8], strides = [1, 1]} : vector<16x96xf32> to vector<16x8xf32>
    %cst_46 = arith.constant dense<0.000000e+00> : vector<16x16xf32>
    %129 = tpu.matmul %126, %127, %cst_46 {dimension_numbers = #tpu.dot_dimension_numbers<[1], [1], [0], [0], [0, 0, 1, 0], [], []>} : vector<16x8xf32>, vector<16x8xf32>, vector<16x16xf32> -> vector<16x16xf32>
    %cst_47 = arith.constant 0.353553385 : f32
    %130 = vector.broadcast %cst_47 : f32 to vector<16x16xf32>
    %131 = arith.mulf %129, %130 : vector<16x16xf32>
    %132 = arith.addf %131, %56 : vector<16x16xf32>
    %cst_48 = arith.constant dense<0xFF800000> : vector<16xf32>
    %133 = vector.multi_reduction <maximumf>, %132, %cst_48 [1] : vector<16x16xf32> to vector<16xf32>
    %134 = vector.shape_cast %133 : vector<16xf32> to vector<16x1xf32>
    %135 = vector.broadcast %134 : vector<16x1xf32> to vector<16x16xf32>
    %136 = arith.subf %132, %135 : vector<16x16xf32>
    %137 = math.exp %136 : vector<16x16xf32>
    %cst_49 = arith.constant dense<0.000000e+00> : vector<16xf32>
    %138 = vector.multi_reduction <add>, %137, %cst_49 [1] : vector<16x16xf32> to vector<16xf32>
    %139 = vector.shape_cast %138 : vector<16xf32> to vector<16x1xf32>
    %140 = tpu.reciprocal %139 {approx = true} : vector<16x1xf32> -> vector<16x1xf32>
    %141 = vector.broadcast %140 : vector<16x1xf32> to vector<16x16xf32>
    %142 = arith.mulf %137, %141 : vector<16x16xf32>
    %cst_50 = arith.constant dense<0.000000e+00> : vector<16x8xf32>
    %143 = tpu.matmul %142, %128, %cst_50 {dimension_numbers = #tpu.dot_dimension_numbers<[1], [0], [0], [1], [0, 0, 1, 1], [], []>} : vector<16x16xf32>, vector<16x8xf32>, vector<16x8xf32> -> vector<16x8xf32>
    %144 = tpu.concatenate %89, %107, %125, %143 in 1 : vector<16x8xf32>, vector<16x8xf32>, vector<16x8xf32>, vector<16x8xf32> -> vector<16x32xf32>
    %c0_51 = arith.constant 0 : index
    %c0_52 = arith.constant 0 : index
    %c0_53 = arith.constant 0 : index
    %145 = vector.load %arg6[%c0_51, %c0_52, %c0_53] : memref<2x32x32xf32, #tpu.memory_space<vmem>>, vector<1x32x32xf32>
    %146 = vector.shape_cast %145 : vector<1x32x32xf32> to vector<32x32xf32>
    %cst_54 = arith.constant dense<0.000000e+00> : vector<16x32xf32>
    %147 = tpu.matmul %144, %146, %cst_54 {dimension_numbers = #tpu.dot_dimension_numbers<[1], [0], [0], [1], [0, 0, 1, 1], [], []>} : vector<16x32xf32>, vector<32x32xf32>, vector<16x32xf32> -> vector<16x32xf32>
    %148 = vector.broadcast %60 : vector<1x32xf32> to vector<16x32xf32>
    %149 = arith.addf %147, %148 : vector<16x32xf32>
    %150 = arith.addf %149, %35 : vector<16x32xf32>
    %cst_55 = arith.constant dense<0.000000e+00> : vector<16xf32>
    %151 = vector.multi_reduction <add>, %150, %cst_55 [1] : vector<16x32xf32> to vector<16xf32>
    %152 = vector.shape_cast %151 : vector<16xf32> to vector<16x1xf32>
    %cst_56 = arith.constant 3.200000e+01 : f32
    %153 = vector.broadcast %cst_56 : f32 to vector<16x1xf32>
    %154 = arith.divf %152, %153 : vector<16x1xf32>
    %155 = vector.broadcast %154 : vector<16x1xf32> to vector<16x32xf32>
    %156 = arith.subf %150, %155 : vector<16x32xf32>
    %157 = arith.mulf %156, %156 : vector<16x32xf32>
    %cst_57 = arith.constant dense<0.000000e+00> : vector<16xf32>
    %158 = vector.multi_reduction <add>, %157, %cst_57 [1] : vector<16x32xf32> to vector<16xf32>
    %159 = vector.shape_cast %158 : vector<16xf32> to vector<16x1xf32>
    %cst_58 = arith.constant 3.200000e+01 : f32
    %160 = vector.broadcast %cst_58 : f32 to vector<16x1xf32>
    %161 = arith.divf %159, %160 : vector<16x1xf32>
    %162 = vector.broadcast %154 : vector<16x1xf32> to vector<16x32xf32>
    %163 = arith.subf %150, %162 : vector<16x32xf32>
    %cst_59 = arith.constant 9.99999996E-13 : f32
    %164 = vector.broadcast %cst_59 : f32 to vector<16x1xf32>
    %165 = arith.addf %161, %164 : vector<16x1xf32>
    %166 = math.rsqrt %165 : vector<16x1xf32>
    %167 = vector.broadcast %166 : vector<16x1xf32> to vector<16x32xf32>
    %168 = arith.mulf %163, %167 : vector<16x32xf32>
    %169 = vector.broadcast %61 : vector<1x32xf32> to vector<16x32xf32>
    %170 = arith.mulf %168, %169 : vector<16x32xf32>
    %171 = vector.broadcast %62 : vector<1x32xf32> to vector<16x32xf32>
    %172 = arith.addf %170, %171 : vector<16x32xf32>
    %c0_60 = arith.constant 0 : index
    %c0_61 = arith.constant 0 : index
    %c0_62 = arith.constant 0 : index
    %173 = vector.load %arg7[%c0_60, %c0_61, %c0_62] : memref<2x32x64xf32, #tpu.memory_space<vmem>>, vector<1x32x64xf32>
    %174 = vector.shape_cast %173 : vector<1x32x64xf32> to vector<32x64xf32>
    %cst_63 = arith.constant dense<0.000000e+00> : vector<16x64xf32>
    %175 = tpu.matmul %172, %174, %cst_63 {dimension_numbers = #tpu.dot_dimension_numbers<[1], [0], [0], [1], [0, 0, 1, 1], [], []>} : vector<16x32xf32>, vector<32x64xf32>, vector<16x64xf32> -> vector<16x64xf32>
    %176 = vector.broadcast %63 : vector<1x64xf32> to vector<16x64xf32>
    %177 = arith.addf %175, %176 : vector<16x64xf32>
    %178 = arith.mulf %177, %177 : vector<16x64xf32>
    %179 = arith.mulf %177, %178 : vector<16x64xf32>
    %cst_64 = arith.constant 4.471500e-02 : f32
    %180 = vector.broadcast %cst_64 : f32 to vector<16x64xf32>
    %181 = arith.mulf %180, %179 : vector<16x64xf32>
    %182 = arith.addf %177, %181 : vector<16x64xf32>
    %cst_65 = arith.constant 0.797884583 : f32
    %183 = vector.broadcast %cst_65 : f32 to vector<16x64xf32>
    %184 = arith.mulf %183, %182 : vector<16x64xf32>
    %185 = math.tanh %184 : vector<16x64xf32>
    %cst_66 = arith.constant 1.000000e+00 : f32
    %186 = vector.broadcast %cst_66 : f32 to vector<16x64xf32>
    %187 = arith.addf %186, %185 : vector<16x64xf32>
    %cst_67 = arith.constant 5.000000e-01 : f32
    %188 = vector.broadcast %cst_67 : f32 to vector<16x64xf32>
    %189 = arith.mulf %188, %187 : vector<16x64xf32>
    %190 = arith.mulf %177, %189 : vector<16x64xf32>
    %c0_68 = arith.constant 0 : index
    %c0_69 = arith.constant 0 : index
    %c0_70 = arith.constant 0 : index
    %191 = vector.load %arg8[%c0_68, %c0_69, %c0_70] : memref<2x64x32xf32, #tpu.memory_space<vmem>>, vector<1x64x32xf32>
    %192 = vector.shape_cast %191 : vector<1x64x32xf32> to vector<64x32xf32>
    %cst_71 = arith.constant dense<0.000000e+00> : vector<16x32xf32>
    %193 = tpu.matmul %190, %192, %cst_71 {dimension_numbers = #tpu.dot_dimension_numbers<[1], [0], [0], [1], [0, 0, 1, 1], [], []>} : vector<16x64xf32>, vector<64x32xf32>, vector<16x32xf32> -> vector<16x32xf32>
    %194 = vector.broadcast %64 : vector<1x32xf32> to vector<16x32xf32>
    %195 = arith.addf %193, %194 : vector<16x32xf32>
    %196 = arith.addf %195, %172 : vector<16x32xf32>
    %cst_72 = arith.constant dense<0.000000e+00> : vector<16xf32>
    %197 = vector.multi_reduction <add>, %196, %cst_72 [1] : vector<16x32xf32> to vector<16xf32>
    %198 = vector.shape_cast %197 : vector<16xf32> to vector<16x1xf32>
    %cst_73 = arith.constant 3.200000e+01 : f32
    %199 = vector.broadcast %cst_73 : f32 to vector<16x1xf32>
    %200 = arith.divf %198, %199 : vector<16x1xf32>
    %201 = vector.broadcast %200 : vector<16x1xf32> to vector<16x32xf32>
    %202 = arith.subf %196, %201 : vector<16x32xf32>
    %203 = arith.mulf %202, %202 : vector<16x32xf32>
    %cst_74 = arith.constant dense<0.000000e+00> : vector<16xf32>
    %204 = vector.multi_reduction <add>, %203, %cst_74 [1] : vector<16x32xf32> to vector<16xf32>
    %205 = vector.shape_cast %204 : vector<16xf32> to vector<16x1xf32>
    %cst_75 = arith.constant 3.200000e+01 : f32
    %206 = vector.broadcast %cst_75 : f32 to vector<16x1xf32>
    %207 = arith.divf %205, %206 : vector<16x1xf32>
    %208 = vector.broadcast %200 : vector<16x1xf32> to vector<16x32xf32>
    %209 = arith.subf %196, %208 : vector<16x32xf32>
    %cst_76 = arith.constant 9.99999996E-13 : f32
    %210 = vector.broadcast %cst_76 : f32 to vector<16x1xf32>
    %211 = arith.addf %207, %210 : vector<16x1xf32>
    %212 = math.rsqrt %211 : vector<16x1xf32>
    %213 = vector.broadcast %212 : vector<16x1xf32> to vector<16x32xf32>
    %214 = arith.mulf %209, %213 : vector<16x32xf32>
    %215 = vector.broadcast %65 : vector<1x32xf32> to vector<16x32xf32>
    %216 = arith.mulf %214, %215 : vector<16x32xf32>
    %217 = vector.broadcast %66 : vector<1x32xf32> to vector<16x32xf32>
    %218 = arith.addf %216, %217 : vector<16x32xf32>
    %c1_77 = arith.constant 1 : index
    %c0_78 = arith.constant 0 : index
    %c0_79 = arith.constant 0 : index
    %219 = vector.load %arg9[%c1_77, %c0_78, %c0_79] : memref<2x8x96xf32, #tpu.memory_space<vmem>>, vector<1x8x96xf32>
    %220 = vector.shape_cast %219 : vector<1x8x96xf32> to vector<8x96xf32>
    %221 = vector.extract_strided_slice %220 {offsets = [0, 0], sizes = [1, 96], strides = [1, 1]} : vector<8x96xf32> to vector<1x96xf32>
    %222 = vector.extract_strided_slice %220 {offsets = [1, 0], sizes = [1, 32], strides = [1, 1]} : vector<8x96xf32> to vector<1x32xf32>
    %223 = vector.extract_strided_slice %220 {offsets = [2, 0], sizes = [1, 32], strides = [1, 1]} : vector<8x96xf32> to vector<1x32xf32>
    %224 = vector.extract_strided_slice %220 {offsets = [3, 0], sizes = [1, 32], strides = [1, 1]} : vector<8x96xf32> to vector<1x32xf32>
    %225 = vector.extract_strided_slice %220 {offsets = [4, 0], sizes = [1, 64], strides = [1, 1]} : vector<8x96xf32> to vector<1x64xf32>
    %226 = vector.extract_strided_slice %220 {offsets = [5, 0], sizes = [1, 32], strides = [1, 1]} : vector<8x96xf32> to vector<1x32xf32>
    %227 = vector.extract_strided_slice %220 {offsets = [6, 0], sizes = [1, 32], strides = [1, 1]} : vector<8x96xf32> to vector<1x32xf32>
    %228 = vector.extract_strided_slice %220 {offsets = [7, 0], sizes = [1, 32], strides = [1, 1]} : vector<8x96xf32> to vector<1x32xf32>
    %c1_80 = arith.constant 1 : index
    %c0_81 = arith.constant 0 : index
    %c0_82 = arith.constant 0 : index
    %229 = vector.load %arg5[%c1_80, %c0_81, %c0_82] : memref<2x32x96xf32, #tpu.memory_space<vmem>>, vector<1x32x96xf32>
    %230 = vector.shape_cast %229 : vector<1x32x96xf32> to vector<32x96xf32>
    %cst_83 = arith.constant dense<0.000000e+00> : vector<16x96xf32>
    %231 = tpu.matmul %218, %230, %cst_83 {dimension_numbers = #tpu.dot_dimension_numbers<[1], [0], [0], [1], [0, 0, 1, 1], [], []>} : vector<16x32xf32>, vector<32x96xf32>, vector<16x96xf32> -> vector<16x96xf32>
    %232 = vector.broadcast %221 : vector<1x96xf32> to vector<16x96xf32>
    %233 = arith.addf %231, %232 : vector<16x96xf32>
    %234 = vector.extract_strided_slice %233 {offsets = [0, 0], sizes = [16, 8], strides = [1, 1]} : vector<16x96xf32> to vector<16x8xf32>
    %235 = vector.extract_strided_slice %233 {offsets = [0, 32], sizes = [16, 8], strides = [1, 1]} : vector<16x96xf32> to vector<16x8xf32>
    %236 = vector.extract_strided_slice %233 {offsets = [0, 64], sizes = [16, 8], strides = [1, 1]} : vector<16x96xf32> to vector<16x8xf32>
    %cst_84 = arith.constant dense<0.000000e+00> : vector<16x16xf32>
    %237 = tpu.matmul %234, %235, %cst_84 {dimension_numbers = #tpu.dot_dimension_numbers<[1], [1], [0], [0], [0, 0, 1, 0], [], []>} : vector<16x8xf32>, vector<16x8xf32>, vector<16x16xf32> -> vector<16x16xf32>
    %cst_85 = arith.constant 0.353553385 : f32
    %238 = vector.broadcast %cst_85 : f32 to vector<16x16xf32>
    %239 = arith.mulf %237, %238 : vector<16x16xf32>
    %240 = arith.addf %239, %56 : vector<16x16xf32>
    %cst_86 = arith.constant dense<0xFF800000> : vector<16xf32>
    %241 = vector.multi_reduction <maximumf>, %240, %cst_86 [1] : vector<16x16xf32> to vector<16xf32>
    %242 = vector.shape_cast %241 : vector<16xf32> to vector<16x1xf32>
    %243 = vector.broadcast %242 : vector<16x1xf32> to vector<16x16xf32>
    %244 = arith.subf %240, %243 : vector<16x16xf32>
    %245 = math.exp %244 : vector<16x16xf32>
    %cst_87 = arith.constant dense<0.000000e+00> : vector<16xf32>
    %246 = vector.multi_reduction <add>, %245, %cst_87 [1] : vector<16x16xf32> to vector<16xf32>
    %247 = vector.shape_cast %246 : vector<16xf32> to vector<16x1xf32>
    %248 = tpu.reciprocal %247 {approx = true} : vector<16x1xf32> -> vector<16x1xf32>
    %249 = vector.broadcast %248 : vector<16x1xf32> to vector<16x16xf32>
    %250 = arith.mulf %245, %249 : vector<16x16xf32>
    %cst_88 = arith.constant dense<0.000000e+00> : vector<16x8xf32>
    %251 = tpu.matmul %250, %236, %cst_88 {dimension_numbers = #tpu.dot_dimension_numbers<[1], [0], [0], [1], [0, 0, 1, 1], [], []>} : vector<16x16xf32>, vector<16x8xf32>, vector<16x8xf32> -> vector<16x8xf32>
    %252 = vector.extract_strided_slice %233 {offsets = [0, 8], sizes = [16, 8], strides = [1, 1]} : vector<16x96xf32> to vector<16x8xf32>
    %253 = vector.extract_strided_slice %233 {offsets = [0, 40], sizes = [16, 8], strides = [1, 1]} : vector<16x96xf32> to vector<16x8xf32>
    %254 = vector.extract_strided_slice %233 {offsets = [0, 72], sizes = [16, 8], strides = [1, 1]} : vector<16x96xf32> to vector<16x8xf32>
    %cst_89 = arith.constant dense<0.000000e+00> : vector<16x16xf32>
    %255 = tpu.matmul %252, %253, %cst_89 {dimension_numbers = #tpu.dot_dimension_numbers<[1], [1], [0], [0], [0, 0, 1, 0], [], []>} : vector<16x8xf32>, vector<16x8xf32>, vector<16x16xf32> -> vector<16x16xf32>
    %cst_90 = arith.constant 0.353553385 : f32
    %256 = vector.broadcast %cst_90 : f32 to vector<16x16xf32>
    %257 = arith.mulf %255, %256 : vector<16x16xf32>
    %258 = arith.addf %257, %56 : vector<16x16xf32>
    %cst_91 = arith.constant dense<0xFF800000> : vector<16xf32>
    %259 = vector.multi_reduction <maximumf>, %258, %cst_91 [1] : vector<16x16xf32> to vector<16xf32>
    %260 = vector.shape_cast %259 : vector<16xf32> to vector<16x1xf32>
    %261 = vector.broadcast %260 : vector<16x1xf32> to vector<16x16xf32>
    %262 = arith.subf %258, %261 : vector<16x16xf32>
    %263 = math.exp %262 : vector<16x16xf32>
    %cst_92 = arith.constant dense<0.000000e+00> : vector<16xf32>
    %264 = vector.multi_reduction <add>, %263, %cst_92 [1] : vector<16x16xf32> to vector<16xf32>
    %265 = vector.shape_cast %264 : vector<16xf32> to vector<16x1xf32>
    %266 = tpu.reciprocal %265 {approx = true} : vector<16x1xf32> -> vector<16x1xf32>
    %267 = vector.broadcast %266 : vector<16x1xf32> to vector<16x16xf32>
    %268 = arith.mulf %263, %267 : vector<16x16xf32>
    %cst_93 = arith.constant dense<0.000000e+00> : vector<16x8xf32>
    %269 = tpu.matmul %268, %254, %cst_93 {dimension_numbers = #tpu.dot_dimension_numbers<[1], [0], [0], [1], [0, 0, 1, 1], [], []>} : vector<16x16xf32>, vector<16x8xf32>, vector<16x8xf32> -> vector<16x8xf32>
    %270 = vector.extract_strided_slice %233 {offsets = [0, 16], sizes = [16, 8], strides = [1, 1]} : vector<16x96xf32> to vector<16x8xf32>
    %271 = vector.extract_strided_slice %233 {offsets = [0, 48], sizes = [16, 8], strides = [1, 1]} : vector<16x96xf32> to vector<16x8xf32>
    %272 = vector.extract_strided_slice %233 {offsets = [0, 80], sizes = [16, 8], strides = [1, 1]} : vector<16x96xf32> to vector<16x8xf32>
    %cst_94 = arith.constant dense<0.000000e+00> : vector<16x16xf32>
    %273 = tpu.matmul %270, %271, %cst_94 {dimension_numbers = #tpu.dot_dimension_numbers<[1], [1], [0], [0], [0, 0, 1, 0], [], []>} : vector<16x8xf32>, vector<16x8xf32>, vector<16x16xf32> -> vector<16x16xf32>
    %cst_95 = arith.constant 0.353553385 : f32
    %274 = vector.broadcast %cst_95 : f32 to vector<16x16xf32>
    %275 = arith.mulf %273, %274 : vector<16x16xf32>
    %276 = arith.addf %275, %56 : vector<16x16xf32>
    %cst_96 = arith.constant dense<0xFF800000> : vector<16xf32>
    %277 = vector.multi_reduction <maximumf>, %276, %cst_96 [1] : vector<16x16xf32> to vector<16xf32>
    %278 = vector.shape_cast %277 : vector<16xf32> to vector<16x1xf32>
    %279 = vector.broadcast %278 : vector<16x1xf32> to vector<16x16xf32>
    %280 = arith.subf %276, %279 : vector<16x16xf32>
    %281 = math.exp %280 : vector<16x16xf32>
    %cst_97 = arith.constant dense<0.000000e+00> : vector<16xf32>
    %282 = vector.multi_reduction <add>, %281, %cst_97 [1] : vector<16x16xf32> to vector<16xf32>
    %283 = vector.shape_cast %282 : vector<16xf32> to vector<16x1xf32>
    %284 = tpu.reciprocal %283 {approx = true} : vector<16x1xf32> -> vector<16x1xf32>
    %285 = vector.broadcast %284 : vector<16x1xf32> to vector<16x16xf32>
    %286 = arith.mulf %281, %285 : vector<16x16xf32>
    %cst_98 = arith.constant dense<0.000000e+00> : vector<16x8xf32>
    %287 = tpu.matmul %286, %272, %cst_98 {dimension_numbers = #tpu.dot_dimension_numbers<[1], [0], [0], [1], [0, 0, 1, 1], [], []>} : vector<16x16xf32>, vector<16x8xf32>, vector<16x8xf32> -> vector<16x8xf32>
    %288 = vector.extract_strided_slice %233 {offsets = [0, 24], sizes = [16, 8], strides = [1, 1]} : vector<16x96xf32> to vector<16x8xf32>
    %289 = vector.extract_strided_slice %233 {offsets = [0, 56], sizes = [16, 8], strides = [1, 1]} : vector<16x96xf32> to vector<16x8xf32>
    %290 = vector.extract_strided_slice %233 {offsets = [0, 88], sizes = [16, 8], strides = [1, 1]} : vector<16x96xf32> to vector<16x8xf32>
    %cst_99 = arith.constant dense<0.000000e+00> : vector<16x16xf32>
    %291 = tpu.matmul %288, %289, %cst_99 {dimension_numbers = #tpu.dot_dimension_numbers<[1], [1], [0], [0], [0, 0, 1, 0], [], []>} : vector<16x8xf32>, vector<16x8xf32>, vector<16x16xf32> -> vector<16x16xf32>
    %cst_100 = arith.constant 0.353553385 : f32
    %292 = vector.broadcast %cst_100 : f32 to vector<16x16xf32>
    %293 = arith.mulf %291, %292 : vector<16x16xf32>
    %294 = arith.addf %293, %56 : vector<16x16xf32>
    %cst_101 = arith.constant dense<0xFF800000> : vector<16xf32>
    %295 = vector.multi_reduction <maximumf>, %294, %cst_101 [1] : vector<16x16xf32> to vector<16xf32>
    %296 = vector.shape_cast %295 : vector<16xf32> to vector<16x1xf32>
    %297 = vector.broadcast %296 : vector<16x1xf32> to vector<16x16xf32>
    %298 = arith.subf %294, %297 : vector<16x16xf32>
    %299 = math.exp %298 : vector<16x16xf32>
    %cst_102 = arith.constant dense<0.000000e+00> : vector<16xf32>
    %300 = vector.multi_reduction <add>, %299, %cst_102 [1] : vector<16x16xf32> to vector<16xf32>
    %301 = vector.shape_cast %300 : vector<16xf32> to vector<16x1xf32>
    %302 = tpu.reciprocal %301 {approx = true} : vector<16x1xf32> -> vector<16x1xf32>
    %303 = vector.broadcast %302 : vector<16x1xf32> to vector<16x16xf32>
    %304 = arith.mulf %299, %303 : vector<16x16xf32>
    %cst_103 = arith.constant dense<0.000000e+00> : vector<16x8xf32>
    %305 = tpu.matmul %304, %290, %cst_103 {dimension_numbers = #tpu.dot_dimension_numbers<[1], [0], [0], [1], [0, 0, 1, 1], [], []>} : vector<16x16xf32>, vector<16x8xf32>, vector<16x8xf32> -> vector<16x8xf32>
    %306 = tpu.concatenate %251, %269, %287, %305 in 1 : vector<16x8xf32>, vector<16x8xf32>, vector<16x8xf32>, vector<16x8xf32> -> vector<16x32xf32>
    %c1_104 = arith.constant 1 : index
    %c0_105 = arith.constant 0 : index
    %c0_106 = arith.constant 0 : index
    %307 = vector.load %arg6[%c1_104, %c0_105, %c0_106] : memref<2x32x32xf32, #tpu.memory_space<vmem>>, vector<1x32x32xf32>
    %308 = vector.shape_cast %307 : vector<1x32x32xf32> to vector<32x32xf32>
    %cst_107 = arith.constant dense<0.000000e+00> : vector<16x32xf32>
    %309 = tpu.matmul %306, %308, %cst_107 {dimension_numbers = #tpu.dot_dimension_numbers<[1], [0], [0], [1], [0, 0, 1, 1], [], []>} : vector<16x32xf32>, vector<32x32xf32>, vector<16x32xf32> -> vector<16x32xf32>
    %310 = vector.broadcast %222 : vector<1x32xf32> to vector<16x32xf32>
    %311 = arith.addf %309, %310 : vector<16x32xf32>
    %312 = arith.addf %311, %218 : vector<16x32xf32>
    %cst_108 = arith.constant dense<0.000000e+00> : vector<16xf32>
    %313 = vector.multi_reduction <add>, %312, %cst_108 [1] : vector<16x32xf32> to vector<16xf32>
    %314 = vector.shape_cast %313 : vector<16xf32> to vector<16x1xf32>
    %cst_109 = arith.constant 3.200000e+01 : f32
    %315 = vector.broadcast %cst_109 : f32 to vector<16x1xf32>
    %316 = arith.divf %314, %315 : vector<16x1xf32>
    %317 = vector.broadcast %316 : vector<16x1xf32> to vector<16x32xf32>
    %318 = arith.subf %312, %317 : vector<16x32xf32>
    %319 = arith.mulf %318, %318 : vector<16x32xf32>
    %cst_110 = arith.constant dense<0.000000e+00> : vector<16xf32>
    %320 = vector.multi_reduction <add>, %319, %cst_110 [1] : vector<16x32xf32> to vector<16xf32>
    %321 = vector.shape_cast %320 : vector<16xf32> to vector<16x1xf32>
    %cst_111 = arith.constant 3.200000e+01 : f32
    %322 = vector.broadcast %cst_111 : f32 to vector<16x1xf32>
    %323 = arith.divf %321, %322 : vector<16x1xf32>
    %324 = vector.broadcast %316 : vector<16x1xf32> to vector<16x32xf32>
    %325 = arith.subf %312, %324 : vector<16x32xf32>
    %cst_112 = arith.constant 9.99999996E-13 : f32
    %326 = vector.broadcast %cst_112 : f32 to vector<16x1xf32>
    %327 = arith.addf %323, %326 : vector<16x1xf32>
    %328 = math.rsqrt %327 : vector<16x1xf32>
    %329 = vector.broadcast %328 : vector<16x1xf32> to vector<16x32xf32>
    %330 = arith.mulf %325, %329 : vector<16x32xf32>
    %331 = vector.broadcast %223 : vector<1x32xf32> to vector<16x32xf32>
    %332 = arith.mulf %330, %331 : vector<16x32xf32>
    %333 = vector.broadcast %224 : vector<1x32xf32> to vector<16x32xf32>
    %334 = arith.addf %332, %333 : vector<16x32xf32>
    %c1_113 = arith.constant 1 : index
    %c0_114 = arith.constant 0 : index
    %c0_115 = arith.constant 0 : index
    %335 = vector.load %arg7[%c1_113, %c0_114, %c0_115] : memref<2x32x64xf32, #tpu.memory_space<vmem>>, vector<1x32x64xf32>
    %336 = vector.shape_cast %335 : vector<1x32x64xf32> to vector<32x64xf32>
    %cst_116 = arith.constant dense<0.000000e+00> : vector<16x64xf32>
    %337 = tpu.matmul %334, %336, %cst_116 {dimension_numbers = #tpu.dot_dimension_numbers<[1], [0], [0], [1], [0, 0, 1, 1], [], []>} : vector<16x32xf32>, vector<32x64xf32>, vector<16x64xf32> -> vector<16x64xf32>
    %338 = vector.broadcast %225 : vector<1x64xf32> to vector<16x64xf32>
    %339 = arith.addf %337, %338 : vector<16x64xf32>
    %340 = arith.mulf %339, %339 : vector<16x64xf32>
    %341 = arith.mulf %339, %340 : vector<16x64xf32>
    %cst_117 = arith.constant 4.471500e-02 : f32
    %342 = vector.broadcast %cst_117 : f32 to vector<16x64xf32>
    %343 = arith.mulf %342, %341 : vector<16x64xf32>
    %344 = arith.addf %339, %343 : vector<16x64xf32>
    %cst_118 = arith.constant 0.797884583 : f32
    %345 = vector.broadcast %cst_118 : f32 to vector<16x64xf32>
    %346 = arith.mulf %345, %344 : vector<16x64xf32>
    %347 = math.tanh %346 : vector<16x64xf32>
    %cst_119 = arith.constant 1.000000e+00 : f32
    %348 = vector.broadcast %cst_119 : f32 to vector<16x64xf32>
    %349 = arith.addf %348, %347 : vector<16x64xf32>
    %cst_120 = arith.constant 5.000000e-01 : f32
    %350 = vector.broadcast %cst_120 : f32 to vector<16x64xf32>
    %351 = arith.mulf %350, %349 : vector<16x64xf32>
    %352 = arith.mulf %339, %351 : vector<16x64xf32>
    %c1_121 = arith.constant 1 : index
    %c0_122 = arith.constant 0 : index
    %c0_123 = arith.constant 0 : index
    %353 = vector.load %arg8[%c1_121, %c0_122, %c0_123] : memref<2x64x32xf32, #tpu.memory_space<vmem>>, vector<1x64x32xf32>
    %354 = vector.shape_cast %353 : vector<1x64x32xf32> to vector<64x32xf32>
    %cst_124 = arith.constant dense<0.000000e+00> : vector<16x32xf32>
    %355 = tpu.matmul %352, %354, %cst_124 {dimension_numbers = #tpu.dot_dimension_numbers<[1], [0], [0], [1], [0, 0, 1, 1], [], []>} : vector<16x64xf32>, vector<64x32xf32>, vector<16x32xf32> -> vector<16x32xf32>
    %356 = vector.broadcast %226 : vector<1x32xf32> to vector<16x32xf32>
    %357 = arith.addf %355, %356 : vector<16x32xf32>
    %358 = arith.addf %357, %334 : vector<16x32xf32>
    %cst_125 = arith.constant dense<0.000000e+00> : vector<16xf32>
    %359 = vector.multi_reduction <add>, %358, %cst_125 [1] : vector<16x32xf32> to vector<16xf32>
    %360 = vector.shape_cast %359 : vector<16xf32> to vector<16x1xf32>
    %cst_126 = arith.constant 3.200000e+01 : f32
    %361 = vector.broadcast %cst_126 : f32 to vector<16x1xf32>
    %362 = arith.divf %360, %361 : vector<16x1xf32>
    %363 = vector.broadcast %362 : vector<16x1xf32> to vector<16x32xf32>
    %364 = arith.subf %358, %363 : vector<16x32xf32>
    %365 = arith.mulf %364, %364 : vector<16x32xf32>
    %cst_127 = arith.constant dense<0.000000e+00> : vector<16xf32>
    %366 = vector.multi_reduction <add>, %365, %cst_127 [1] : vector<16x32xf32> to vector<16xf32>
    %367 = vector.shape_cast %366 : vector<16xf32> to vector<16x1xf32>
    %cst_128 = arith.constant 3.200000e+01 : f32
    %368 = vector.broadcast %cst_128 : f32 to vector<16x1xf32>
    %369 = arith.divf %367, %368 : vector<16x1xf32>
    %370 = vector.broadcast %362 : vector<16x1xf32> to vector<16x32xf32>
    %371 = arith.subf %358, %370 : vector<16x32xf32>
    %cst_129 = arith.constant 9.99999996E-13 : f32
    %372 = vector.broadcast %cst_129 : f32 to vector<16x1xf32>
    %373 = arith.addf %369, %372 : vector<16x1xf32>
    %374 = math.rsqrt %373 : vector<16x1xf32>
    %375 = vector.broadcast %374 : vector<16x1xf32> to vector<16x32xf32>
    %376 = arith.mulf %371, %375 : vector<16x32xf32>
    %377 = vector.broadcast %227 : vector<1x32xf32> to vector<16x32xf32>
    %378 = arith.mulf %376, %377 : vector<16x32xf32>
    %379 = vector.broadcast %228 : vector<1x32xf32> to vector<16x32xf32>
    %380 = arith.addf %378, %379 : vector<16x32xf32>
    %381 = vector.extract_strided_slice %380 {offsets = [0, 0], sizes = [1, 32], strides = [1, 1]} : vector<16x32xf32> to vector<1x32xf32>
    %382 = vector.extract_strided_slice %380 {offsets = [8, 0], sizes = [1, 32], strides = [1, 1]} : vector<16x32xf32> to vector<1x32xf32>
    %383 = tpu.concatenate %381, %382 in 0 : vector<1x32xf32>, vector<1x32xf32> -> vector<2x32xf32>
    %c0_130 = arith.constant 0 : index
    %c0_131 = arith.constant 0 : index
    %384 = vector.load %arg10[%c0_130, %c0_131] : memref<33x9xf32, #tpu.memory_space<vmem>>, vector<33x9xf32>
    %385 = vector.extract_strided_slice %384 {offsets = [0, 0], sizes = [32, 9], strides = [1, 1]} : vector<33x9xf32> to vector<32x9xf32>
    %cst_132 = arith.constant dense<0.000000e+00> : vector<2x9xf32>
    %386 = tpu.matmul %383, %385, %cst_132 {dimension_numbers = #tpu.dot_dimension_numbers<[1], [0], [0], [1], [0, 0, 1, 1], [], []>} : vector<2x32xf32>, vector<32x9xf32>, vector<2x9xf32> -> vector<2x9xf32>
    %c0_133 = arith.constant 0 : index
    %c0_134 = arith.constant 0 : index
    %387 = vector.load %arg10[%c0_133, %c0_134] : memref<33x9xf32, #tpu.memory_space<vmem>>, vector<33x9xf32>
    %388 = vector.extract_strided_slice %387 {offsets = [32, 0], sizes = [1, 9], strides = [1, 1]} : vector<33x9xf32> to vector<1x9xf32>
    %389 = vector.broadcast %388 : vector<1x9xf32> to vector<2x9xf32>
    %390 = arith.addf %386, %389 : vector<2x9xf32>
    %c0_135 = arith.constant 0 : index
    %c0_136 = arith.constant 0 : index
    %391 = vector.load %arg11[%c0_135, %c0_136] : memref<2x9xf32, #tpu.memory_space<vmem>>, vector<2x9xf32>
    tpu.vector_store %arg11[%c0_135, %c0_136], %390 {strides = array<i32>} : memref<2x9xf32, #tpu.memory_space<vmem>>, vector<2x9xf32>,
    return
  }
}

</mosaic_0001>

<bundles_post_ra>
// kernel: bert_forward.1
= control target key start
LH: loop header
LB: loop body
LE: loop exit
PB: predicated region body
PF: predicated region fallthrough
CT: control target
= control target key end

     0   :  { %v3751_v0 = vmov 0   ;;  %vm67_vm0 = vcmask 1041408   ;;  %v40_v13 = vlaneseq  ;;  %vm60_vm1 = vcmask 408576   ;;  %s3753_s28 = smov 96   ;;  %s3756_s12 = smov 64   ;;  %s4383_s0 = inlined_call_operand.vmem [shape: s32[16,1], index: 0, kind: input, shape index: {}]   ;;  %s4384_s2 = inlined_call_operand.vmem [shape: f32[50,32], index: 2, kind: input, shape index: {}]   ;;  %s4385_s3 = inlined_call_operand.vmem [shape: f32[16,32], index: 3, kind: input, shape index: {}]   ;;  %s4386_s5 = inlined_call_operand.vmem [shape: f32[2,32,96], index: 5, kind: input, shape index: {}]   ;;  %s4387_s4 = inlined_call_operand.vmem [shape: f32[2,32], index: 4, kind: input, shape index: {}]   ;;  %s4388_s9 = inlined_call_operand.vmem [shape: f32[2,8,96], index: 9, kind: input, shape index: {}]   ;;  %s4389_s1 = inlined_call_operand.vmem [shape: f32[1,16], index: 1, kind: input, shape index: {}]   ;;  %s4390_s6 = inlined_call_operand.vmem [shape: f32[2,32,32], index: 6, kind: input, shape index: {}]   ;;  %s4391_s7 = inlined_call_operand.vmem [shape: f32[2,32,64], index: 7, kind: input, shape index: {}]   ;;  %s4392_s8 = inlined_call_operand.vmem [shape: f32[2,64,32], index: 8, kind: input, shape index: {}]   ;;  %s4393_s10 = inlined_call_operand.vmem [shape: f32[33,9], index: 10, kind: input, shape index: {}]   ;;  %s4394_s11 = inlined_call_operand.vmem [shape: f32[2,9], index: 11, kind: output, shape index: {}]  }
   0x1   :  { %3578 = vset.pattern.permute.xlu0 %v3751_v0  ;;  %v38_v1 = vld [vmem:[%s4383_s0] sm:$0xff]  ;;  %v53_v3 = vld [vmem:[%s4384_s2 + $0x8] sm:$0xff]  ;;  %v54_v4 = vld [vmem:[%s4384_s2 + $0x10] sm:$0xff]  ;;  %v3752_v16 = vmov 0.0   ;;  %vm148_vm4 = vcmask 261120   ;;  %vm189_vm5 = vcmask 64512  }
   0x2   :  { %v52_v2 = vld [vmem:[%s4384_s2] sm:$0xff]  ;;  %43 = vperm.xlu0 %3578, %v38_v1   ;;  %v55_v5 = vld [vmem:[%s4384_s2 + $0x18] sm:$0xff]  ;;  %v39_v6 = vld [vmem:[%s4383_s0 + $0x8] sm:$0xff]  ;;  %v41_v14 = vand.u32 127, %v40_v13  ;;  %v3894_v59 = vshrl.u32 %v40_v13, 7  ;;  %vm387_vm9 = vcmask 130048  }
   0x3   :  { %v3381_v7 = vpack.c.bf16 %v53_v3, %v52_v2  ;;  %v3385_v8 = vpack.c.bf16 %v55_v5, %v54_v4  ;;  %v56_v9 = vld [vmem:[%s4384_s2 + $0x20] sm:$0xff]  ;;  %v57_v10 = vld [vmem:[%s4384_s2 + $0x28] sm:$0xff]  ;;  %v58_v12 = vld [vmem:[%s4384_s2 + $0x30] sm:$0x3]  ;;  %s3757_s13 = smov 120   ;;  %s3758_s14 = smov 56  }
   0x4   :  { %v3389_v11 = vpack.c.bf16 %v57_v10, %v56_v9  ;;  %v59_v20 = vld [vmem:[%s4385_s3] sm:$0xff]  ;;  %v206_v38 = vld [vmem:[%s4386_s5 + $0x8] sm:$0xff]  ;;  %v207_v39 = vld [vmem:[%s4386_s5 + $0x10] sm:$0xff]  ;;  %v3897_v60 = vsub.s32 0, %v3894_v59  ;;  %s3759_s15 = smov 112   ;;  %s3760_s0 = smov 80  }
   0x5   :  { %3382 = vmatprep.subr.bf16.mxu0 %v3381_v7  ;;  %v205_v37 = vld [vmem:[%s4386_s5] sm:$0xff]  ;;  %v208_v41 = vld [vmem:[%s4386_s5 + $0x18] sm:$0xff]  ;;  %vm3920_vm6 = vmpackc.low %vm189_vm5, %vm189_vm5  ;;  %s3761_s2 = smov 48   ;;  %s3762_s3 = smov 104   ;;  %vm1137_vm10 = vcmask 195584   ;;  %vm1388_vm11 = vcmask 523264  }
   0x6   :  { %46 = vperm.xlu0 %3578, %v39_v6   ;;  %3384 = vmatpush3.bf16.msra.mxu0 %v3381_v7  ;;  %v3393_v40 = vpack.c.bf16 %v206_v38, %v205_v37  ;;  %v3397_v42 = vpack.c.bf16 %v208_v41, %v207_v39  ;;  %v2914_v50 = vld [vmem:[%s4387_s4] ss:$0 sm:$0xff]  ;;  %v2915_v52 = vld [vmem:[%s4387_s4 + $0x1] ss:$0 sm:$0xff]  ;;  %s3763_s16 = smov 72   ;;  %s3764_s17 = smov 40  }
   0x7   :  { %3386 = vmatprep.subr.bf16.mxu0 %v3385_v8  ;;  %v3902_v61 = vld [vmem:[%s4388_s9] sm:$0xff]  ;;  %s3765_s18 = smov 8   ;;  %s3766_s19 = smov 16   ;;  %vm3769_vm12 = vmmov 0   ;;  %vm2821_vm13 = vcmask 1040384   ;;  %vm2905_vm14 = vcmask 66560  }
   0x8   :  { %3394 = vmatprep.subr.bf16.mxu1 %v3393_v40  ;;  %v212_v62 = vrot.slane %v3902_v61, %v3897_v60  ;;  %v188_v9 = vld [vmem:[%s4389_s1] sm:$0x1]  ;;  %s3755_s1 = smov 88   ;;  %s3767_s27 = smov 24  }
   0x9   :  { %3396 = vmatpush3.bf16.msra.mxu1 %v3393_v40  ;;  %v197_v10 = vsel %vm189_vm5, 0.0, %v188_v9 }
   0xa   :  { %3388 = vmatpush3.bf16.msra.mxu0 %v3385_v8  ;;  %3398 = vmatprep.subr.bf16.mxu1 %v3397_v42  ;;  %vm198_vm7 = vcmp.gt.f32.partialorder %v197_v10, 0.5 }
   0xb   :  { %3390 = vmatprep.subr.bf16.mxu0 %v3389_v11 }
   0xd   :  { %3400 = vmatpush3.bf16.msra.mxu1 %v3397_v42 }
   0xe   :  { %3392 = vmatpush3.bf16.msra.mxu0 %v3389_v11  ;;  %v190_v11 = vsel %vm189_vm5, %v188_v9, 0.0 }
   0xf   :  { %3149 = vmatprep.subr.msk.mxu0 %vm67_vm0, %v58_v12  ;;  %vm191_vm8 = vcmp.gt.f32.partialorder %v190_v11, 0.5 }
  0x12   :  { %3150 = vmatpush3.msk.msra.mxu0 %vm67_vm0, %v58_v12  ;;  %v3754_v12 = vmov -1e+09  }
  0x13   :  { %v199_v13 = vsel %vm198_vm7, 0.0, %v3754_v12 }
  0x81   :  { %v44_v15 = vpop.permute.xlu0 %43 }
  0x82   :  { %vm48_vm2 = vcmp.eq.s32.totalorder %v44_v15, %v41_v14  ;;  %v3936_v15 = vrot.slane %v199_v13, %v3897_v60 }
  0x83   :  { %v50_v17 = vsel %vm48_vm2, 1.0, %v3752_v16 }
  0x84   :  { %3151 = vmatprep.mubr.msk.f32.mxu0 %vm60_vm1, %v50_v17 }
  0x85   :  { %v47_v18 = vpop.permute.xlu0 %46 }
  0x86   :  { %vm49_vm3 = vcmp.eq.s32.totalorder %v47_v18, %v41_v14  ;;  %v192_v14 = vsel %vm191_vm8, 0.0, %v3754_v12 }
  0x87   :  { %v51_v19 = vsel %vm49_vm3, 1.0, %v3752_v16  ;;  %v3939_v17 = vrot.slane %v192_v14, %v3897_v60 }
  0x88   :  { %3152 = vmatmul.mubr.msk.f32.vlgmr.msra.gmra.mrb[0].mxu0 %vm60_vm1, %v51_v19 }
 0x15b   :  { %v3153_v21 = vpop.f32.mrb[0].mxu0 }
 0x15c   :  { %v137_v22 = vpop.f32.mrb[1].mxu0  ;;  %v143_v24 = vadd.f32 %v3153_v21, %v59_v20 }
 0x15d   :  { %v138_v23 = vadd.f32 %v137_v22, %v59_v20 }
 0x15e   :  { %v152_v26 = vsel %vm148_vm4, %v143_v24, 0.0 }
 0x15f   :  { %v149_v25 = vsel %vm148_vm4, %v138_v23, 0.0 }
 0x160   :  { %150 = vadd.xlane.f32.xlu1 %v149_v25 }
 0x164   :  { %153 = vadd.xlane.f32.xlu1 %v152_v26 }
 0x1ed   :  { %v151_v27 = vpop.xlane.xlu1 %150 }
 0x1ee   :  { %v156_v28 = vmul.f32 0.03125, %v151_v27 }
 0x1f0   :  { %v158_v29 = vsub.f32 %v138_v23, %v156_v28 }
 0x1f1   :  { %v154_v30 = vpop.xlane.xlu1 %153 }
 0x1f2   :  { %v157_v31 = vmul.f32 0.03125, %v154_v30  ;;  %v160_v32 = vmul.f32 %v158_v29, %v158_v29 }
 0x1f4   :  { %v159_v33 = vsub.f32 %v143_v24, %v157_v31  ;;  %v162_v34 = vsel %vm148_vm4, %v160_v32, 0.0 }
 0x1f5   :  { %163 = vadd.xlane.f32.xlu0 %v162_v34 }
 0x1f6   :  { %v161_v35 = vmul.f32 %v159_v33, %v159_v33 }
 0x1f8   :  { %v165_v36 = vsel %vm148_vm4, %v161_v35, 0.0 }
 0x1f9   :  { %166 = vadd.xlane.f32.xlu1 %v165_v36 }
 0x282   :  { %v164_v43 = vpop.xlane.xlu0 %163 }
 0x283   :  { %v168_v44 = vmul.f32 0.03125, %v164_v43 }
 0x285   :  { %v170_v45 = vadd.f32 1e-12, %v168_v44 }
 0x286   :  { %v167_v46 = vpop.xlane.xlu1 %166 }
 0x287   :  { %3659 = vrsqrt.f32 %v170_v45  ;;  %v169_v47 = vmul.f32 0.03125, %v167_v46 }
 0x289   :  { %v171_v48 = vadd.f32 1e-12, %v169_v47 }
 0x28b   :  { %3661 = vrsqrt.f32 %v171_v48 }
 0x291   :  { %v3660_v49 = vpop.eup %3659 }
 0x292   :  { %v174_v51 = vmul.f32 %v3660_v49, %v158_v29 }
 0x294   :  { %v180_v53 = vmul.f32 %v2914_v50, %v174_v51 }
 0x295   :  { %v3662_v54 = vpop.eup %3661 }
 0x296   :  { %v175_v55 = vmul.f32 %v3662_v54, %v159_v33  ;;  %v3885_v56 = vadd.f32 %v2915_v52, %v180_v53 }
 0x298   :  { %v181_v57 = vmul.f32 %v2914_v50, %v175_v55  ;;  %3162 = vmatprep.mubr.msk.f32.mxu1 %vm148_vm4, %v3885_v56 }
 0x29a   :  { %v3889_v58 = vadd.f32 %v2915_v52, %v181_v57 }
 0x29c   :  { %3163 = vmatmul.mubr.msk.f32.vlgmr.msra.gmra.mrb[0].mxu1 %vm148_vm4, %v3889_v58 }
 0x36f   :  { %v3164_v63 = vpop.f32.mrb[0].mxu1 }
 0x370   :  { %v3906_v0 = vadd.f32 %v3164_v63, %v212_v62  ;;  %v285_v1 = vpop.f32.mrb[1].mxu1 }
 0x371   :  { %v3908_v2 = vadd.f32 %v285_v1, %v212_v62 }
 0x373   :  { %3169 = vmatprep.mubr.msk.f32.mxu1 %vm189_vm5, %v3908_v2  ;;  %v3914_v3 = vpack.i.bf16 %v3906_v0, %v3908_v2 }
 0x375   :  { %3580 = vrot.lane.b32.xlu1 %v3914_v3, %s3753_s28 }
 0x3e7   :  { %v3581_v4 = vpop.permute.xlu1 %3580 }
 0x3e8   :  { %v3583_v5 = vunpack.i.h.bf16 %v3581_v4  ;;  %v3582_v6 = vunpack.i.l.bf16 %v3581_v4 }
 0x3ea   :  { %v3401_v8 = vpack.c.bf16 %v3583_v5, %v3582_v6 }
 0x3ec   :  { %3403 = vmatprep.subr.msk.bf16.mxu1 %vm3920_vm6, %v3401_v8 }
 0x3ed   :  { %3406 = vmatpush3.bf16.xpose.msk.msra.mxu1 %vm3920_vm6, %v3401_v8 }
 0x3f4   :  { %3170 = vmatmul.mubr.msk.f32.vlgmr.msra.gmra.mrb[2].mxu1 %vm189_vm5, %v3906_v0 }
 0x4c7   :  { %v3171_v18 = vpop.f32.mrb[2].mxu1 }
 0x4c8   :  { %v384_v19 = vmul.f32 0.35355338, %v3171_v18  ;;  %v374_v20 = vpop.f32.mrb[3].mxu1 }
 0x4c9   :  { %v383_v21 = vmul.f32 0.35355338, %v374_v20 }
 0x4ca   :  { %v386_v22 = vadd.f32 %v384_v19, %v3936_v15 }
 0x4cb   :  { %v385_v23 = vadd.f32 %v383_v21, %v3939_v17 }
 0x4cc   :  { %v391_v24 = vsel %vm387_vm9, %v386_v22, -inf }
 0x4cd   :  { %392 = vmax.xlane.f32.xlu0 %v391_v24  ;;  %v388_v25 = vsel %vm387_vm9, %v385_v23, -inf }
 0x4ce   :  { %389 = vmax.xlane.f32.xlu1 %v388_v25 }
 0x4df   :  { %3590 = vrot.lane.b32.xlu1 %v3914_v3, %s3755_s1 }
 0x4e3   :  { %3585 = vrot.lane.b32.xlu0 %v3914_v3, %s3756_s12 }
 0x55a   :  { %v393_v26 = vpop.xlane.xlu0 %392 }
 0x55b   :  { %v395_v27 = vsub.f32 %v386_v22, %v393_v26  ;;  %v390_v28 = vpop.xlane.xlu1 %389 }
 0x55c   :  { %v394_v29 = vsub.f32 %v385_v23, %v390_v28 }
 0x55d   :  { %v398_v30 = vmul.f32 1.442695, %v395_v27 }
 0x55e   :  { %v396_v31 = vmul.f32 1.442695, %v394_v29  ;;  %v3586_v32 = vpop.permute.xlu0 %3585 }
 0x55f   :  { %3663 = vpow2.f32 %v398_v30  ;;  %v3588_v33 = vunpack.i.h.bf16 %v3586_v32  ;;  %v3587_v34 = vunpack.i.l.bf16 %v3586_v32  ;;  %v3591_v35 = vpop.permute.xlu1 %3590 }
 0x560   :  { %v3593_v36 = vunpack.i.h.bf16 %v3591_v35  ;;  %v3592_v37 = vunpack.i.l.bf16 %v3591_v35  ;;  %3665 = vpow2.f32 %v396_v31 }
 0x561   :  { %v3407_v38 = vpack.c.bf16 %v3588_v33, %v3587_v34 }
 0x562   :  { %v3411_v39 = vpack.c.bf16 %v3593_v36, %v3592_v37 }
 0x563   :  { %3408 = vmatprep.subr.bf16.mxu1 %v3407_v38 }
 0x564   :  { %3410 = vmatpush3.bf16.msra.mxu1 %v3407_v38 }
 0x565   :  { %3413 = vmatprep.subr.msk.bf16.mxu1 %vm3920_vm6, %v3411_v39 }
 0x569   :  { %v3664_v40 = vpop.eup %3663 }
 0x56a   :  { %v403_v41 = vsel %vm387_vm9, %v3664_v40, 0.0  ;;  %v3666_v42 = vpop.eup %3665 }
 0x56b   :  { %404 = vadd.xlane.f32.xlu0 %v403_v41  ;;  %v400_v43 = vsel %vm387_vm9, %v3666_v42, 0.0 }
 0x56f   :  { %401 = vadd.xlane.f32.xlu0 %v400_v43 }
 0x585   :  { %497 = vrot.lane.b32.xlu0 %v3908_v2, %s3757_s13 }
 0x589   :  { %499 = vrot.lane.b32.xlu0 %v3906_v0, %s3757_s13 }
 0x5f8   :  { %v405_v44 = vpop.xlane.xlu0 %404 }
 0x5f9   :  { %3667 = vrcp.f32 %v405_v44 }
 0x5fc   :  { %v402_v45 = vpop.xlane.xlu0 %401 }
 0x5fd   :  { %3669 = vrcp.f32 %v402_v45 }
 0x600   :  { %v498_v50 = vpop.permute.xlu0 %497 }
 0x603   :  { %v3668_v46 = vpop.eup %3667 }
 0x604   :  { %v409_v49 = vmul.f32 %v3668_v46, %v3664_v40  ;;  %v500_v51 = vpop.permute.xlu0 %499 }
 0x607   :  { %v3670_v47 = vpop.eup %3669 }
 0x608   :  { %v408_v48 = vmul.f32 %v3670_v47, %v3666_v42 }
 0x60a   :  { %3176 = vmatprep.mubr.msk.f32.mxu1 %vm387_vm9, %v408_v48 }
 0x60b   :  { %3177 = vmatmul.mubr.msk.f32.vlgmr.msra.gmra.mrb[4].mxu1 %vm387_vm9, %v409_v49 }
 0x60c   :  { %3416 = vmatpush3.bf16.xpose.msk.msra.mxu1 %vm3920_vm6, %v3411_v39  ;;  %3183 = vmatprep.mubr.msk.f32.mxu1 %vm189_vm5, %v498_v50 }
 0x613   :  { %3184 = vmatmul.mubr.msk.f32.vlgmr.msra.gmra.mrb[6].mxu1 %vm189_vm5, %v500_v51 }
 0x6de   :  { %v3963_v52 = vpop.f32.mrb[4].mxu1 }
 0x6df   :  { %v3965_v53 = vpop.f32.mrb[5].mxu1 }
 0x6e6   :  { %v3185_v54 = vpop.f32.mrb[6].mxu1 }
 0x6e7   :  { %v589_v55 = vmul.f32 0.35355338, %v3185_v54  ;;  %v579_v57 = vpop.f32.mrb[7].mxu1 }
 0x6e8   :  { %v588_v62 = vmul.f32 0.35355338, %v579_v57 }
 0x6e9   :  { %v591_v63 = vadd.f32 %v589_v55, %v3936_v15 }
 0x6ea   :  { %v590_v1 = vadd.f32 %v588_v62, %v3939_v17 }
 0x6eb   :  { %v595_v4 = vsel %vm387_vm9, %v591_v63, -inf }
 0x6ec   :  { %596 = vmax.xlane.f32.xlu1 %v595_v4  ;;  %v592_v5 = vsel %vm387_vm9, %v590_v1, -inf }
 0x6ed   :  { %593 = vmax.xlane.f32.xlu0 %v592_v5 }
 0x6fd   :  { %3595 = vrot.lane.b32.xlu1 %v3914_v3, %s3758_s14 }
 0x701   :  { %701 = vrot.lane.b32.xlu1 %v3908_v2, %s3759_s15 }
 0x705   :  { %703 = vrot.lane.b32.xlu1 %v3906_v0, %s3759_s15 }
 0x779   :  { %v597_v6 = vpop.xlane.xlu1 %596 }
 0x77a   :  { %v599_v8 = vsub.f32 %v591_v63, %v597_v6  ;;  %v594_v9 = vpop.xlane.xlu0 %593 }
 0x77b   :  { %v598_v10 = vsub.f32 %v590_v1, %v594_v9 }
 0x77c   :  { %v602_v11 = vmul.f32 1.442695, %v599_v8 }
 0x77d   :  { %v600_v12 = vmul.f32 1.442695, %v598_v10  ;;  %v3596_v13 = vpop.permute.xlu1 %3595 }
 0x77e   :  { %3671 = vpow2.f32 %v602_v11  ;;  %v3598_v14 = vunpack.i.h.bf16 %v3596_v13  ;;  %v3597_v18 = vunpack.i.l.bf16 %v3596_v13 }
 0x77f   :  { %3673 = vpow2.f32 %v600_v12 }
 0x780   :  { %v3417_v19 = vpack.c.bf16 %v3598_v14, %v3597_v18 }
 0x781   :  { %v702_v34 = vpop.permute.xlu1 %701 }
 0x782   :  { %3418 = vmatprep.subr.bf16.mxu0 %v3417_v19 }
 0x783   :  { %3420 = vmatpush3.bf16.msra.mxu0 %v3417_v19 }
 0x785   :  { %v704_v35 = vpop.permute.xlu1 %703 }
 0x788   :  { %v3672_v20 = vpop.eup %3671 }
 0x789   :  { %v607_v21 = vsel %vm387_vm9, %v3672_v20, 0.0  ;;  %v3674_v22 = vpop.eup %3673 }
 0x78a   :  { %608 = vadd.xlane.f32.xlu0 %v607_v21  ;;  %v604_v23 = vsel %vm387_vm9, %v3674_v22, 0.0 }
 0x78e   :  { %605 = vadd.xlane.f32.xlu0 %v604_v23 }
 0x7a4   :  { %3600 = vrot.lane.b32.xlu0 %v3914_v3, %s3760_s0 }
 0x817   :  { %v609_v24 = vpop.xlane.xlu0 %608 }
 0x818   :  { %3675 = vrcp.f32 %v609_v24 }
 0x81b   :  { %v606_v25 = vpop.xlane.xlu0 %605 }
 0x81c   :  { %3677 = vrcp.f32 %v606_v25 }
 0x81f   :  { %v3601_v26 = vpop.permute.xlu0 %3600 }
 0x820   :  { %v3603_v27 = vunpack.i.h.bf16 %v3601_v26  ;;  %v3602_v28 = vunpack.i.l.bf16 %v3601_v26 }
 0x822   :  { %v3421_v29 = vpack.c.bf16 %v3603_v27, %v3602_v28  ;;  %v3676_v30 = vpop.eup %3675 }
 0x823   :  { %v613_v33 = vmul.f32 %v3676_v30, %v3672_v20 }
 0x824   :  { %3423 = vmatprep.subr.msk.bf16.mxu0 %vm3920_vm6, %v3421_v29 }
 0x826   :  { %v3678_v31 = vpop.eup %3677 }
 0x827   :  { %v612_v32 = vmul.f32 %v3678_v31, %v3674_v22 }
 0x829   :  { %3190 = vmatprep.mubr.msk.f32.mxu0 %vm387_vm9, %v612_v32 }
 0x82a   :  { %3191 = vmatmul.mubr.msk.f32.vlgmr.msra.gmra.mrb[2].mxu0 %vm387_vm9, %v613_v33 }
 0x82b   :  { %3426 = vmatpush3.bf16.xpose.msk.msra.mxu0 %vm3920_vm6, %v3421_v29  ;;  %3197 = vmatprep.mubr.msk.f32.mxu0 %vm189_vm5, %v702_v34 }
 0x832   :  { %3198 = vmatmul.mubr.msk.f32.vlgmr.msra.gmra.mrb[4].mxu0 %vm189_vm5, %v704_v35 }
 0x8fd   :  { %v3989_v36 = vpop.f32.mrb[2].mxu0 }
 0x8fe   :  { %v3991_v37 = vpop.f32.mrb[3].mxu0 }
 0x905   :  { %v3199_v38 = vpop.f32.mrb[4].mxu0 }
 0x906   :  { %v793_v39 = vmul.f32 0.35355338, %v3199_v38  ;;  %v783_v40 = vpop.f32.mrb[5].mxu0 }
 0x907   :  { %v792_v41 = vmul.f32 0.35355338, %v783_v40 }
 0x908   :  { %v795_v42 = vadd.f32 %v793_v39, %v3936_v15 }
 0x909   :  { %v794_v43 = vadd.f32 %v792_v41, %v3939_v17 }
 0x90a   :  { %v799_v44 = vsel %vm387_vm9, %v795_v42, -inf }
 0x90b   :  { %800 = vmax.xlane.f32.xlu1 %v799_v44  ;;  %v796_v45 = vsel %vm387_vm9, %v794_v43, -inf }
 0x90c   :  { %797 = vmax.xlane.f32.xlu0 %v796_v45 }
 0x91c   :  { %3605 = vrot.lane.b32.xlu1 %v3914_v3, %s3761_s2 }
 0x920   :  { %905 = vrot.lane.b32.xlu1 %v3908_v2, %s3762_s3 }
 0x924   :  { %907 = vrot.lane.b32.xlu1 %v3906_v0, %s3762_s3 }
 0x998   :  { %v801_v46 = vpop.xlane.xlu1 %800 }
 0x999   :  { %v803_v47 = vsub.f32 %v795_v42, %v801_v46  ;;  %v798_v48 = vpop.xlane.xlu0 %797 }
 0x99a   :  { %v802_v49 = vsub.f32 %v794_v43, %v798_v48 }
 0x99b   :  { %v806_v50 = vmul.f32 1.442695, %v803_v47 }
 0x99c   :  { %v804_v51 = vmul.f32 1.442695, %v802_v49  ;;  %v3606_v54 = vpop.permute.xlu1 %3605 }
 0x99d   :  { %3679 = vpow2.f32 %v806_v50  ;;  %v3608_v55 = vunpack.i.h.bf16 %v3606_v54  ;;  %v3607_v57 = vunpack.i.l.bf16 %v3606_v54  ;;  %v1140_v50 = vld [vmem:[%s4390_s6] sm:$0xff] }
 0x99e   :  { %3681 = vpow2.f32 %v804_v51  ;;  %v1142_v51 = vld [vmem:[%s4390_s6 + $0x10] sm:$0xff] }
 0x99f   :  { %v3427_v62 = vpack.c.bf16 %v3608_v55, %v3607_v57  ;;  %v1143_v55 = vld [vmem:[%s4390_s6 + $0x18] sm:$0xff] }
 0x9a0   :  { %v906_v18 = vpop.permute.xlu1 %905  ;;  %v3445_v57 = vpack.c.bf16 %v1143_v55, %v1142_v51 }
 0x9a1   :  { %3428 = vmatprep.subr.bf16.mxu1 %v3427_v62 }
 0x9a2   :  { %3430 = vmatpush3.bf16.msra.mxu1 %v3427_v62 }
 0x9a4   :  { %v908_v19 = vpop.permute.xlu1 %907 }
 0x9a7   :  { %v3680_v63 = vpop.eup %3679 }
 0x9a8   :  { %v811_v2 = vsel %vm387_vm9, %v3680_v63, 0.0  ;;  %v3682_v1 = vpop.eup %3681 }
 0x9a9   :  { %812 = vadd.xlane.f32.xlu0 %v811_v2  ;;  %v808_v0 = vsel %vm387_vm9, %v3682_v1, 0.0 }
 0x9ad   :  { %809 = vadd.xlane.f32.xlu0 %v808_v0 }
 0x9c3   :  { %3610 = vrot.lane.b32.xlu0 %v3914_v3, %s3763_s16 }
 0xa36   :  { %v813_v4 = vpop.xlane.xlu0 %812 }
 0xa37   :  { %3683 = vrcp.f32 %v813_v4 }
 0xa3a   :  { %v810_v5 = vpop.xlane.xlu0 %809 }
 0xa3b   :  { %3685 = vrcp.f32 %v810_v5 }
 0xa3e   :  { %v3611_v6 = vpop.permute.xlu0 %3610 }
 0xa3f   :  { %v3613_v8 = vunpack.i.h.bf16 %v3611_v6  ;;  %v3612_v9 = vunpack.i.l.bf16 %v3611_v6 }
 0xa41   :  { %v3431_v10 = vpack.c.bf16 %v3613_v8, %v3612_v9  ;;  %v3684_v11 = vpop.eup %3683 }
 0xa42   :  { %v817_v14 = vmul.f32 %v3684_v11, %v3680_v63 }
 0xa43   :  { %3433 = vmatprep.subr.msk.bf16.mxu1 %vm3920_vm6, %v3431_v10 }
 0xa45   :  { %v3686_v12 = vpop.eup %3685 }
 0xa46   :  { %v816_v13 = vmul.f32 %v3686_v12, %v3682_v1 }
 0xa48   :  { %3204 = vmatprep.mubr.msk.f32.mxu1 %vm387_vm9, %v816_v13 }
 0xa49   :  { %3205 = vmatmul.mubr.msk.f32.vlgmr.msra.gmra.mrb[8].mxu1 %vm387_vm9, %v817_v14 }
 0xa4a   :  { %3436 = vmatpush3.bf16.xpose.msk.msra.mxu1 %vm3920_vm6, %v3431_v10  ;;  %3211 = vmatprep.mubr.msk.f32.mxu1 %vm189_vm5, %v906_v18 }
 0xa51   :  { %3212 = vmatmul.mubr.msk.f32.vlgmr.msra.gmra.mrb[10].mxu1 %vm189_vm5, %v908_v19 }
 0xb1c   :  { %v3206_v20 = vpop.f32.mrb[8].mxu1 }
 0xb1d   :  { %v896_v21 = vpop.f32.mrb[9].mxu1 }
 0xb24   :  { %v3213_v22 = vpop.f32.mrb[10].mxu1 }
 0xb25   :  { %v997_v23 = vmul.f32 0.35355338, %v3213_v22  ;;  %v987_v24 = vpop.f32.mrb[11].mxu1 }
 0xb26   :  { %v996_v25 = vmul.f32 0.35355338, %v987_v24 }
 0xb27   :  { %v999_v26 = vadd.f32 %v997_v23, %v3936_v15 }
 0xb28   :  { %v998_v27 = vadd.f32 %v996_v25, %v3939_v17 }
 0xb29   :  { %v1003_v28 = vsel %vm387_vm9, %v999_v26, -inf }
 0xb2a   :  { %1004 = vmax.xlane.f32.xlu1 %v1003_v28  ;;  %v1000_v29 = vsel %vm387_vm9, %v998_v27, -inf }
 0xb2b   :  { %1001 = vmax.xlane.f32.xlu0 %v1000_v29 }
 0xb3b   :  { %3615 = vrot.lane.b32.xlu1 %v3914_v3, %s3764_s17 }
 0xb3f   :  { %1113 = vrot.lane.b32.xlu1 %v3989_v36, %s3765_s18 }
 0xb43   :  { %1119 = vrot.lane.b32.xlu1 %v896_v21, %s3766_s19 }
 0xbb7   :  { %v1005_v30 = vpop.xlane.xlu1 %1004 }
 0xbb8   :  { %v1007_v31 = vsub.f32 %v999_v26, %v1005_v30  ;;  %v1002_v32 = vpop.xlane.xlu0 %1001 }
 0xbb9   :  { %v1006_v33 = vsub.f32 %v998_v27, %v1002_v32 }
 0xbba   :  { %v1010_v34 = vmul.f32 1.442695, %v1007_v31 }
 0xbbb   :  { %v1008_v35 = vmul.f32 1.442695, %v1006_v33  ;;  %v3616_v38 = vpop.permute.xlu1 %3615 }
 0xbbc   :  { %v3618_v39 = vunpack.i.h.bf16 %v3616_v38  ;;  %v3617_v40 = vunpack.i.l.bf16 %v3616_v38  ;;  %v1271_v38 = vld [vmem:[%s4391_s7 + $0x10] sm:$0xff] }
 0xbbd   :  { %3687 = vpow2.f32 %v1008_v35 }
 0xbbe   :  { %v3437_v41 = vpack.c.bf16 %v3618_v39, %v3617_v40  ;;  %3689 = vpow2.f32 %v1010_v34  ;;  %v1270_v34 = vld [vmem:[%s4391_s7 + $0x8] sm:$0xff]  ;;  %v1272_v39 = vld [vmem:[%s4391_s7 + $0x18] sm:$0xff] }
 0xbbf   :  { %v1114_v1 = vpop.permute.xlu1 %1113  ;;  %v3453_v40 = vpack.c.bf16 %v1272_v39, %v1271_v38  ;;  %v1386_v39 = vsub.s32 5, %v3894_v59 }
 0xbc0   :  { %3438 = vmatprep.subr.bf16.mxu0 %v3437_v41  ;;  %v1134_v8 = vsel %vm189_vm5, %v3963_v52, %v1114_v1 }
 0xbc1   :  { %3440 = vmatpush3.bf16.msra.mxu0 %v3437_v41 }
 0xbc3   :  { %v1120_v4 = vpop.permute.xlu1 %1119 }
 0xbc7   :  { %v3688_v3 = vpop.eup %3687 }
 0xbc8   :  { %v1012_v36 = vsel %vm387_vm9, %v3688_v3, 0.0  ;;  %v3690_v42 = vpop.eup %3689 }
 0xbc9   :  { %1013 = vadd.xlane.f32.xlu0 %v1012_v36  ;;  %v1015_v43 = vsel %vm387_vm9, %v3690_v42, 0.0 }
 0xbcd   :  { %1016 = vadd.xlane.f32.xlu0 %v1015_v43 }
 0xbe3   :  { %1111 = vrot.lane.b32.xlu0 %v3991_v37, %s3765_s18  ;;  %v1141_v37 = vld [vmem:[%s4390_s6 + $0x8] sm:$0xff] }
 0xbe4   :  { %v3441_v54 = vpack.c.bf16 %v1141_v37, %v1140_v50 }
 0xbe6   :  { %3442 = vmatprep.subr.bf16.mxu0 %v3441_v54 }
 0xbe7   :  { %1121 = vrot.lane.b32.xlu0 %v3206_v20, %s3766_s19 }
 0xc56   :  { %v1014_v44 = vpop.xlane.xlu0 %1013 }
 0xc57   :  { %3691 = vrcp.f32 %v1014_v44 }
 0xc5a   :  { %v1017_v45 = vpop.xlane.xlu0 %1016 }
 0xc5b   :  { %3693 = vrcp.f32 %v1017_v45  ;;  %v1259_v45 = vsub.s32 2, %v3894_v59 }
 0xc5e   :  { %v1112_v2 = vpop.permute.xlu0 %1111 }
 0xc5f   :  { %v1133_v5 = vsel %vm189_vm5, %v3965_v53, %v1112_v2  ;;  %v1146_v53 = vsub.s32 1, %v3894_v59  ;;  %v1377_v2 = vld [vmem:[%s4392_s8 + $0x8] sm:$0xff] }
 0xc60   :  { %v1135_v10 = vsel %vm387_vm9, %v1133_v5, %v1120_v4  ;;  %v1379_v4 = vld [vmem:[%s4392_s8 + $0x18] sm:$0xff] }
 0xc61   :  { %v3692_v46 = vpop.eup %3691  ;;  %v1147_v14 = vrot.slane %v3902_v61, %v1146_v53 }
 0xc62   :  { %v1020_v47 = vmul.f32 %v3692_v46, %v3688_v3  ;;  %v1122_v0 = vpop.permute.xlu0 %1121  ;;  %v1265_v46 = vsub.s32 3, %v3894_v59 }
 0xc63   :  { %v1136_v11 = vsel %vm387_vm9, %v1134_v8, %v1122_v0  ;;  %v1378_v0 = vld [vmem:[%s4392_s8 + $0x10] sm:$0xff]  ;;  %v1381_v8 = vld [vmem:[%s4392_s8 + $0x28] sm:$0xff] }
 0xc64   :  { %3218 = vmatprep.mubr.msk.f32.mxu0 %vm387_vm9, %v1020_v47  ;;  %v1260_v47 = vrot.slane %v3902_v61, %v1259_v45  ;;  %v1266_v51 = vrot.slane %v3902_v61, %v1265_v46  ;;  %v3461_v5 = vpack.c.bf16 %v1379_v4, %v1378_v0  ;;  %v2950_v0 = vld [vmem:[%s4386_s5 + $0x28] sm:$0xff] }
 0xc65   :  { %v3694_v48 = vpop.eup %3693 }
 0xc66   :  { %v1021_v49 = vmul.f32 %v3694_v48, %v3690_v42 }
 0xc68   :  { %3219 = vmatmul.mubr.msk.f32.vlgmr.msra.gmra.mrb[6].mxu0 %vm387_vm9, %v1021_v49 }
 0xc69   :  { %3444 = vmatpush3.bf16.msra.mxu0 %v3441_v54 }
 0xc6a   :  { %3446 = vmatprep.subr.bf16.mxu0 %v3445_v57 }
 0xc6d   :  { %3448 = vmatpush3.bf16.msra.mxu0 %v3445_v57 }
 0xd3b   :  { %v3220_v62 = vpop.f32.mrb[6].mxu0 }
 0xd3c   :  { %1129 = vrot.lane.b32.xlu0 %v3220_v62, %s3767_s27  ;;  %v1100_v63 = vpop.f32.mrb[7].mxu0 }
 0xd3d   :  { %1127 = vrot.lane.b32.xlu1 %v1100_v63, %s3767_s27  ;;  %v1376_v63 = vld [vmem:[%s4392_s8] sm:$0xff] }
 0xd3e   :  { %v3457_v1 = vpack.c.bf16 %v1377_v2, %v1376_v63 }
 0xd40   :  { %3458 = vmatprep.subr.bf16.mxu0 %v3457_v1 }
 0xdae   :  { %v1130_v6 = vpop.permute.xlu0 %1129 }
 0xdaf   :  { %v1128_v9 = vpop.permute.xlu1 %1127  ;;  %v1139_v13 = vsel %vm1137_vm10, %v1136_v11, %v1130_v6  ;;  %v1380_v6 = vld [vmem:[%s4392_s8 + $0x20] sm:$0xff]  ;;  %v1383_v11 = vld [vmem:[%s4392_s8 + $0x38] sm:$0xff] }
 0xdb0   :  { %v1138_v12 = vsel %vm1137_vm10, %v1135_v10, %v1128_v9  ;;  %v3465_v9 = vpack.c.bf16 %v1381_v8, %v1380_v6  ;;  %v1382_v10 = vld [vmem:[%s4392_s8 + $0x30] sm:$0xff]  ;;  %v2952_v6 = vld [vmem:[%s4386_s5 + $0x38] sm:$0xff] }
 0xdb1   :  { %3229 = vmatprep.mubr.msk.f32.mxu0 %vm148_vm4, %v1138_v12  ;;  %v3469_v12 = vpack.c.bf16 %v1383_v11, %v1382_v10 }
 0xdb2   :  { %3230 = vmatmul.mubr.msk.f32.vlgmr.msra.gmra.mrb[8].mxu0 %vm148_vm4, %v1139_v13  ;;  %v1275_v13 = vsub.s32 4, %v3894_v59 }
 0xdb3   :  { %3460 = vmatpush3.bf16.msra.mxu0 %v3457_v1 }
 0xdb4   :  { %3462 = vmatprep.subr.bf16.mxu0 %v3461_v5 }
 0xdb7   :  { %3464 = vmatpush3.bf16.msra.mxu0 %v3461_v5  ;;  %v2951_v5 = vld [vmem:[%s4386_s5 + $0x30] sm:$0xff] }
 0xdb8   :  { %3466 = vmatprep.subr.bf16.mxu0 %v3465_v9  ;;  %v3477_v8 = vpack.c.bf16 %v2952_v6, %v2951_v5 }
 0xdbb   :  { %3468 = vmatpush3.bf16.msra.mxu0 %v3465_v9 }
 0xdbc   :  { %3470 = vmatprep.subr.bf16.mxu0 %v3469_v12 }
 0xdbf   :  { %3472 = vmatpush3.bf16.msra.mxu0 %v3469_v12 }
 0xe85   :  { %v3231_v52 = vpop.f32.mrb[8].mxu0 }
 0xe86   :  { %v1226_v18 = vadd.f32 %v3231_v52, %v1147_v14  ;;  %v1220_v19 = vpop.f32.mrb[9].mxu0 }
 0xe87   :  { %v1221_v20 = vadd.f32 %v1220_v19, %v1147_v14  ;;  %v1276_v14 = vrot.slane %v3902_v61, %v1275_v13 }
 0xe88   :  { %v1230_v21 = vadd.f32 %v1226_v18, %v3889_v58 }
 0xe89   :  { %v1229_v22 = vadd.f32 %v1221_v20, %v3885_v56  ;;  %v1269_v56 = vld [vmem:[%s4391_s7] sm:$0xff] }
 0xe8a   :  { %v1234_v23 = vsel %vm148_vm4, %v1230_v21, 0.0  ;;  %v3449_v35 = vpack.c.bf16 %v1270_v34, %v1269_v56 }
 0xe8b   :  { %1235 = vadd.xlane.f32.xlu0 %v1234_v23  ;;  %v1231_v24 = vsel %vm148_vm4, %v1229_v22, 0.0 }
 0xe8c   :  { %1232 = vadd.xlane.f32.xlu1 %v1231_v24  ;;  %3450 = vmatprep.subr.bf16.mxu1 %v3449_v35 }
 0xe8d   :  { %3452 = vmatpush3.bf16.msra.mxu1 %v3449_v35 }
 0xe8e   :  { %3454 = vmatprep.subr.bf16.mxu1 %v3453_v40 }
 0xe91   :  { %3456 = vmatpush3.bf16.msra.mxu1 %v3453_v40  ;;  %v1387_v40 = vrot.slane %v3902_v61, %v1386_v39 }
 0xf18   :  { %v1236_v25 = vpop.xlane.xlu0 %1235 }
 0xf19   :  { %v1238_v26 = vmul.f32 0.03125, %v1236_v25  ;;  %v1233_v27 = vpop.xlane.xlu1 %1232 }
 0xf1a   :  { %v1237_v28 = vmul.f32 0.03125, %v1233_v27 }
 0xf1b   :  { %v1240_v29 = vsub.f32 %v1230_v21, %v1238_v26 }
 0xf1c   :  { %v1239_v30 = vsub.f32 %v1229_v22, %v1237_v28 }
 0xf1d   :  { %v1242_v31 = vmul.f32 %v1240_v29, %v1240_v29 }
 0xf1e   :  { %v1241_v32 = vmul.f32 %v1239_v30, %v1239_v30 }
 0xf1f   :  { %v1246_v33 = vsel %vm148_vm4, %v1242_v31, 0.0 }
 0xf20   :  { %1247 = vadd.xlane.f32.xlu1 %v1246_v33  ;;  %v1243_v58 = vsel %vm148_vm4, %v1241_v32, 0.0 }
 0xf21   :  { %1244 = vadd.xlane.f32.xlu0 %v1243_v58 }
 0xfad   :  { %v1248_v41 = vpop.xlane.xlu1 %1247 }
 0xfae   :  { %v1250_v3 = vmul.f32 0.03125, %v1248_v41  ;;  %v1245_v36 = vpop.xlane.xlu0 %1244 }
 0xfaf   :  { %v1249_v42 = vmul.f32 0.03125, %v1245_v36 }
 0xfb0   :  { %v1252_v43 = vadd.f32 1e-12, %v1250_v3 }
 0xfb1   :  { %v1251_v44 = vadd.f32 1e-12, %v1249_v42 }
 0xfb2   :  { %3695 = vrsqrt.f32 %v1252_v43 }
 0xfb3   :  { %3697 = vrsqrt.f32 %v1251_v44 }
 0xfbc   :  { %v3696_v48 = vpop.eup %3695 }
 0xfbd   :  { %v3698_v49 = vpop.eup %3697  ;;  %v1256_v50 = vmul.f32 %v3696_v48, %v1240_v29 }
 0xfbe   :  { %v1255_v37 = vmul.f32 %v3698_v49, %v1239_v30 }
 0xfbf   :  { %v1262_v54 = vmul.f32 %v1260_v47, %v1256_v50 }
 0xfc0   :  { %v1261_v55 = vmul.f32 %v1260_v47, %v1255_v37 }
 0xfc1   :  { %v1268_v62 = vadd.f32 %v1266_v51, %v1262_v54 }
 0xfc2   :  { %v1267_v57 = vadd.f32 %v1266_v51, %v1261_v55 }
 0xfc4   :  { %3240 = vmatprep.mubr.msk.f32.mxu1 %vm148_vm4, %v1267_v57 }
 0xfc5   :  { %3241 = vmatmul.mubr.msk.f32.vlgmr.msra.gmra.mrb[12].mxu1 %vm148_vm4, %v1268_v62 }
0x1098   :  { %v3242_v52 = vpop.f32.mrb[12].mxu1 }
0x1099   :  { %v1355_v18 = vadd.f32 %v3242_v52, %v1276_v14  ;;  %v1349_v19 = vpop.f32.mrb[13].mxu1 }
0x109a   :  { %v1350_v20 = vadd.f32 %v1349_v19, %v1276_v14  ;;  %v1506_v19 = vsub.s32 7, %v3894_v59 }
0x109b   :  { %v1359_v21 = vmul.f32 %v1355_v18, %v1355_v18 }
0x109c   :  { %v1358_v22 = vmul.f32 %v1350_v20, %v1350_v20 }
0x109d   :  { %v1361_v23 = vmul.f32 %v1359_v21, %v1355_v18 }
0x109e   :  { %v1360_v24 = vmul.f32 %v1358_v22, %v1350_v20 }
0x109f   :  { %v1363_v25 = vmul.f32 0.044715, %v1361_v23 }
0x10a0   :  { %v1362_v26 = vmul.f32 0.044715, %v1360_v24 }
0x10a1   :  { %v1365_v27 = vadd.f32 %v1363_v25, %v1355_v18  ;;  %v1507_v25 = vrot.slane %v3902_v61, %v1506_v19 }
0x10a2   :  { %v1364_v28 = vadd.f32 %v1362_v26, %v1350_v20 }
0x10a3   :  { %v1367_v29 = vmul.f32 0.7978846, %v1365_v27 }
0x10a4   :  { %v1366_v30 = vmul.f32 0.7978846, %v1364_v28 }
0x10a5   :  { %3699 = vtanh.f32 %v1367_v29 }
0x10a6   :  { %3701 = vtanh.f32 %v1366_v30  ;;  %v4156_v30 = vld [vmem:[%s4388_s9 + $0x8] sm:$0xff] }
0x10af   :  { %v3700_v31 = vpop.eup %3699 }
0x10b0   :  { %v3702_v32 = vpop.eup %3701  ;;  %v1371_v33 = vadd.f32 1.0, %v3700_v31 }
0x10b1   :  { %v1370_v58 = vadd.f32 1.0, %v3702_v32 }
0x10b2   :  { %v1373_v56 = vmul.f32 0.5, %v1371_v33 }
0x10b3   :  { %v1372_v34 = vmul.f32 0.5, %v1370_v58 }
0x10b4   :  { %v1375_v38 = vmul.f32 %v1373_v56, %v1355_v18  ;;  %v1500_v18 = vsub.s32 6, %v3894_v59 }
0x10b5   :  { %v1374_v35 = vmul.f32 %v1372_v34, %v1350_v20 }
0x10b6   :  { %v1501_v20 = vrot.slane %v3902_v61, %v1500_v18  ;;  %v1520_v61 = vrot.slane %v4156_v30, %v3897_v60 }
0x10b7   :  { %3259 = vmatprep.mubr.msk.f32.mxu0 %vm1388_vm11, %v1374_v35 }
0x10b8   :  { %3260 = vmatmul.mubr.msk.f32.vlgmr.msra.gmra.mrb[10].mxu0 %vm1388_vm11, %v1375_v38 }
0x118b   :  { %v3261_v41 = vpop.f32.mrb[10].mxu0 }
0x118c   :  { %v1467_v3 = vadd.f32 %v3261_v41, %v1387_v40  ;;  %v1461_v36 = vpop.f32.mrb[11].mxu0 }
0x118d   :  { %v1462_v42 = vadd.f32 %v1461_v36, %v1387_v40 }
0x118e   :  { %v1471_v43 = vadd.f32 %v1467_v3, %v1268_v62 }
0x118f   :  { %v1470_v44 = vadd.f32 %v1462_v42, %v1267_v57  ;;  %v2949_v57 = vld [vmem:[%s4386_s5 + $0x20] sm:$0xff] }
0x1190   :  { %v1475_v47 = vsel %vm148_vm4, %v1471_v43, 0.0  ;;  %v3473_v4 = vpack.c.bf16 %v2950_v0, %v2949_v57 }
0x1191   :  { %1476 = vadd.xlane.f32.xlu1 %v1475_v47  ;;  %v1472_v48 = vsel %vm148_vm4, %v1470_v44, 0.0 }
0x1192   :  { %1473 = vadd.xlane.f32.xlu0 %v1472_v48  ;;  %3474 = vmatprep.subr.bf16.mxu1 %v3473_v4 }
0x1193   :  { %3476 = vmatpush3.bf16.msra.mxu1 %v3473_v4 }
0x1194   :  { %3478 = vmatprep.subr.bf16.mxu1 %v3477_v8 }
0x1197   :  { %3480 = vmatpush3.bf16.msra.mxu1 %v3477_v8 }
0x121e   :  { %v1477_v49 = vpop.xlane.xlu1 %1476 }
0x121f   :  { %v1479_v50 = vmul.f32 0.03125, %v1477_v49  ;;  %v1474_v37 = vpop.xlane.xlu0 %1473 }
0x1220   :  { %v1478_v51 = vmul.f32 0.03125, %v1474_v37 }
0x1221   :  { %v1481_v54 = vsub.f32 %v1471_v43, %v1479_v50 }
0x1222   :  { %v1480_v55 = vsub.f32 %v1470_v44, %v1478_v51 }
0x1223   :  { %v1483_v63 = vmul.f32 %v1481_v54, %v1481_v54 }
0x1224   :  { %v1482_v2 = vmul.f32 %v1480_v55, %v1480_v55 }
0x1225   :  { %v1487_v1 = vsel %vm148_vm4, %v1483_v63, 0.0 }
0x1226   :  { %1488 = vadd.xlane.f32.xlu1 %v1487_v1  ;;  %v1484_v62 = vsel %vm148_vm4, %v1482_v2, 0.0 }
0x1227   :  { %1485 = vadd.xlane.f32.xlu0 %v1484_v62 }
0x12b3   :  { %v1489_v9 = vpop.xlane.xlu1 %1488 }
0x12b4   :  { %v1491_v10 = vmul.f32 0.03125, %v1489_v9  ;;  %v1486_v11 = vpop.xlane.xlu0 %1485 }
0x12b5   :  { %v1490_v12 = vmul.f32 0.03125, %v1486_v11 }
0x12b6   :  { %v1493_v14 = vadd.f32 1e-12, %v1491_v10 }
0x12b7   :  { %v1492_v52 = vadd.f32 1e-12, %v1490_v12 }
0x12b8   :  { %3703 = vrsqrt.f32 %v1493_v14 }
0x12b9   :  { %3705 = vrsqrt.f32 %v1492_v52 }
0x12c2   :  { %v3704_v21 = vpop.eup %3703 }
0x12c3   :  { %v3706_v22 = vpop.eup %3705  ;;  %v1497_v23 = vmul.f32 %v3704_v21, %v1481_v54 }
0x12c4   :  { %v1496_v24 = vmul.f32 %v3706_v22, %v1480_v55 }
0x12c5   :  { %v1503_v26 = vmul.f32 %v1501_v20, %v1497_v23 }
0x12c6   :  { %v1502_v27 = vmul.f32 %v1501_v20, %v1496_v24 }
0x12c7   :  { %v4147_v29 = vadd.f32 %v1507_v25, %v1503_v26 }
0x12c8   :  { %v4145_v28 = vadd.f32 %v1507_v25, %v1502_v27 }
0x12ca   :  { %3270 = vmatprep.mubr.msk.f32.mxu1 %vm148_vm4, %v4145_v28 }
0x12cb   :  { %3271 = vmatmul.mubr.msk.f32.vlgmr.msra.gmra.mrb[14].mxu1 %vm148_vm4, %v4147_v29 }
0x139e   :  { %v3272_v31 = vpop.f32.mrb[14].mxu1 }
0x139f   :  { %v4160_v32 = vadd.f32 %v3272_v31, %v1520_v61  ;;  %v1593_v33 = vpop.f32.mrb[15].mxu1 }
0x13a0   :  { %v4162_v58 = vadd.f32 %v1593_v33, %v1520_v61 }
0x13a2   :  { %3277 = vmatprep.mubr.msk.f32.mxu1 %vm189_vm5, %v4162_v58  ;;  %v4168_v56 = vpack.i.bf16 %v4160_v32, %v4162_v58 }
0x13a4   :  { %3625 = vrot.lane.b32.xlu1 %v4168_v56, %s3755_s1  ;;  %3620 = vrot.lane.b32.xlu0 %v4168_v56, %s3753_s28 }
0x13a8   :  { %1804 = vrot.lane.b32.xlu1 %v4162_v58, %s3757_s13  ;;  %1806 = vrot.lane.b32.xlu0 %v4160_v32, %s3757_s13 }
0x1416   :  { %v3626_v60 = vpop.permute.xlu1 %3625  ;;  %v3621_v34 = vpop.permute.xlu0 %3620 }
0x1417   :  { %v3628_v35 = vunpack.i.h.bf16 %v3626_v60  ;;  %v3627_v38 = vunpack.i.l.bf16 %v3626_v60  ;;  %v3623_v40 = vunpack.i.h.bf16 %v3621_v34  ;;  %v3622_v41 = vunpack.i.l.bf16 %v3621_v34 }
0x1419   :  { %v3481_v3 = vpack.c.bf16 %v3623_v40, %v3622_v41  ;;  %v3491_v36 = vpack.c.bf16 %v3628_v35, %v3627_v38 }
0x141a   :  { %v1805_v42 = vpop.permute.xlu1 %1804  ;;  %v1807_v43 = vpop.permute.xlu0 %1806 }
0x141b   :  { %3483 = vmatprep.subr.msk.bf16.mxu1 %vm3920_vm6, %v3481_v3 }
0x141c   :  { %3486 = vmatpush3.bf16.xpose.msk.msra.mxu1 %vm3920_vm6, %v3481_v3 }
0x141d   :  { %3493 = vmatprep.subr.msk.bf16.mxu1 %vm3920_vm6, %v3491_v36 }
0x1423   :  { %3278 = vmatmul.mubr.msk.f32.vlgmr.msra.gmra.mrb[16].mxu1 %vm189_vm5, %v4160_v32 }
0x1424   :  { %3496 = vmatpush3.bf16.xpose.msk.msra.mxu1 %vm3920_vm6, %v3491_v36  ;;  %3291 = vmatprep.mubr.msk.f32.mxu1 %vm189_vm5, %v1805_v42 }
0x142b   :  { %3292 = vmatmul.mubr.msk.f32.vlgmr.msra.gmra.mrb[18].mxu1 %vm189_vm5, %v1807_v43 }
0x14f6   :  { %v3279_v44 = vpop.f32.mrb[16].mxu1 }
0x14f7   :  { %v1692_v47 = vmul.f32 0.35355338, %v3279_v44  ;;  %v1682_v48 = vpop.f32.mrb[17].mxu1 }
0x14f8   :  { %v1691_v49 = vmul.f32 0.35355338, %v1682_v48 }
0x14f9   :  { %v1694_v50 = vadd.f32 %v1692_v47, %v3936_v15 }
0x14fa   :  { %v1693_v37 = vadd.f32 %v1691_v49, %v3939_v17 }
0x14fb   :  { %v1698_v51 = vsel %vm387_vm9, %v1694_v50, -inf }
0x14fc   :  { %1699 = vmax.xlane.f32.xlu0 %v1698_v51  ;;  %v1695_v54 = vsel %vm387_vm9, %v1693_v37, -inf }
0x14fd   :  { %1696 = vmax.xlane.f32.xlu1 %v1695_v54 }
0x14fe   :  { %v3293_v55 = vpop.f32.mrb[18].mxu1 }
0x14ff   :  { %v1896_v63 = vmul.f32 0.35355338, %v3293_v55  ;;  %v1886_v2 = vpop.f32.mrb[19].mxu1 }
0x1500   :  { %v1895_v1 = vmul.f32 0.35355338, %v1886_v2 }
0x1501   :  { %v1898_v62 = vadd.f32 %v1896_v63, %v3936_v15 }
0x1502   :  { %v1897_v57 = vadd.f32 %v1895_v1, %v3939_v17 }
0x1503   :  { %v1902_v0 = vsel %vm387_vm9, %v1898_v62, -inf }
0x1504   :  { %1903 = vmax.xlane.f32.xlu1 %v1902_v0  ;;  %v1899_v4 = vsel %vm387_vm9, %v1897_v57, -inf }
0x1505   :  { %1900 = vmax.xlane.f32.xlu0 %v1899_v4 }
0x1589   :  { %v1700_v5 = vpop.xlane.xlu0 %1699 }
0x158a   :  { %v1702_v6 = vsub.f32 %v1694_v50, %v1700_v5  ;;  %v1697_v8 = vpop.xlane.xlu1 %1696 }
0x158b   :  { %v1701_v9 = vsub.f32 %v1693_v37, %v1697_v8 }
0x158c   :  { %v1705_v10 = vmul.f32 1.442695, %v1702_v6 }
0x158d   :  { %v1703_v11 = vmul.f32 1.442695, %v1701_v9 }
0x158e   :  { %3707 = vpow2.f32 %v1705_v10 }
0x158f   :  { %3709 = vpow2.f32 %v1703_v11 }
0x1591   :  { %v1904_v12 = vpop.xlane.xlu1 %1903 }
0x1592   :  { %v1906_v14 = vsub.f32 %v1898_v62, %v1904_v12  ;;  %v1901_v52 = vpop.xlane.xlu0 %1900 }
0x1593   :  { %v1905_v20 = vsub.f32 %v1897_v57, %v1901_v52 }
0x1594   :  { %v1909_v21 = vmul.f32 1.442695, %v1906_v14 }
0x1595   :  { %v1907_v22 = vmul.f32 1.442695, %v1905_v20 }
0x1596   :  { %3711 = vpow2.f32 %v1909_v21 }
0x1597   :  { %3713 = vpow2.f32 %v1907_v22 }
0x1598   :  { %v3708_v23 = vpop.eup %3707 }
0x1599   :  { %v3710_v24 = vpop.eup %3709  ;;  %v1710_v25 = vsel %vm387_vm9, %v3708_v23, 0.0 }
0x159a   :  { %1711 = vadd.xlane.f32.xlu1 %v1710_v25  ;;  %v1707_v26 = vsel %vm387_vm9, %v3710_v24, 0.0 }
0x159b   :  { %1708 = vadd.xlane.f32.xlu0 %v1707_v26 }
0x15a0   :  { %v3712_v27 = vpop.eup %3711 }
0x15a1   :  { %v3714_v61 = vpop.eup %3713  ;;  %v1914_v31 = vsel %vm387_vm9, %v3712_v27, 0.0 }
0x15a2   :  { %1915 = vadd.xlane.f32.xlu1 %v1914_v31  ;;  %v1911_v33 = vsel %vm387_vm9, %v3714_v61, 0.0 }
0x15a3   :  { %1912 = vadd.xlane.f32.xlu0 %v1911_v33 }
0x15b3   :  { %3635 = vrot.lane.b32.xlu1 %v4168_v56, %s3758_s14 }
0x15b7   :  { %3640 = vrot.lane.b32.xlu1 %v4168_v56, %s3760_s0 }
0x15b9   :  { %3630 = vrot.lane.b32.xlu0 %v4168_v56, %s3756_s12 }
0x15bb   :  { %2010 = vrot.lane.b32.xlu1 %v4160_v32, %s3759_s15 }
0x15bd   :  { %2008 = vrot.lane.b32.xlu0 %v4162_v58, %s3759_s15 }
0x1627   :  { %v1712_v34 = vpop.xlane.xlu1 %1711 }
0x1628   :  { %v1709_v60 = vpop.xlane.xlu0 %1708 }
0x1629   :  { %3715 = vrcp.f32 %v1709_v60 }
0x162a   :  { %3717 = vrcp.f32 %v1712_v34 }
0x162f   :  { %v1916_v35 = vpop.xlane.xlu1 %1915 }
0x1630   :  { %v1913_v38 = vpop.xlane.xlu0 %1912 }
0x1631   :  { %3719 = vrcp.f32 %v1913_v38 }
0x1632   :  { %3721 = vrcp.f32 %v1916_v35 }
0x1633   :  { %v3716_v40 = vpop.eup %3715  ;;  %v3636_v41 = vpop.permute.xlu1 %3635 }
0x1634   :  { %v3631_v3 = vpop.permute.xlu0 %3630  ;;  %v1715_v36 = vmul.f32 %v3716_v40, %v3710_v24  ;;  %v3638_v42 = vunpack.i.h.bf16 %v3636_v41  ;;  %v3637_v43 = vunpack.i.l.bf16 %v3636_v41  ;;  %v3718_v50 = vpop.eup %3717 }
0x1635   :  { %v3633_v44 = vunpack.i.h.bf16 %v3631_v3  ;;  %v3632_v47 = vunpack.i.l.bf16 %v3631_v3  ;;  %v1716_v63 = vmul.f32 %v3718_v50, %v3708_v23 }
0x1636   :  { %3284 = vmatprep.mubr.msk.f32.mxu0 %vm387_vm9, %v1715_v36  ;;  %v3497_v37 = vpack.c.bf16 %v3638_v42, %v3637_v43 }
0x1637   :  { %v3487_v48 = vpack.c.bf16 %v3633_v44, %v3632_v47  ;;  %v3641_v49 = vpop.permute.xlu1 %3640 }
0x1638   :  { %v3643_v51 = vunpack.i.h.bf16 %v3641_v49  ;;  %v3642_v54 = vunpack.i.l.bf16 %v3641_v49  ;;  %v2009_v0 = vpop.permute.xlu0 %2008 }
0x1639   :  { %3488 = vmatprep.subr.bf16.mxu0 %v3487_v48 }
0x163a   :  { %3490 = vmatpush3.bf16.msra.mxu0 %v3487_v48  ;;  %v3501_v62 = vpack.c.bf16 %v3643_v51, %v3642_v54 }
0x163b   :  { %v3720_v55 = vpop.eup %3719  ;;  %3498 = vmatprep.subr.bf16.mxu0 %v3497_v37  ;;  %v2011_v4 = vpop.permute.xlu1 %2010 }
0x163c   :  { %v3722_v2 = vpop.eup %3721  ;;  %v1919_v1 = vmul.f32 %v3720_v55, %v3714_v61 }
0x163d   :  { %3285 = vmatmul.mubr.msk.f32.vlgmr.msra.gmra.mrb[12].mxu0 %vm387_vm9, %v1716_v63  ;;  %v1920_v57 = vmul.f32 %v3722_v2, %v3712_v27 }
0x163e   :  { %3500 = vmatpush3.bf16.msra.mxu0 %v3497_v37  ;;  %3298 = vmatprep.mubr.msk.f32.mxu0 %vm387_vm9, %v1919_v1 }
0x163f   :  { %3503 = vmatprep.subr.msk.bf16.mxu0 %vm3920_vm6, %v3501_v62 }
0x1641   :  { %3299 = vmatmul.mubr.msk.f32.vlgmr.msra.gmra.mrb[14].mxu0 %vm387_vm9, %v1920_v57 }
0x1642   :  { %3305 = vmatprep.mubr.msk.f32.mxu0 %vm189_vm5, %v2009_v0 }
0x1647   :  { %3506 = vmatpush3.bf16.xpose.msk.msra.mxu0 %vm3920_vm6, %v3501_v62 }
0x164e   :  { %3306 = vmatmul.mubr.msk.f32.vlgmr.msra.gmra.mrb[16].mxu0 %vm189_vm5, %v2011_v4 }
0x1710   :  { %v4222_v5 = vpop.f32.mrb[12].mxu0 }
0x1711   :  { %v4224_v6 = vpop.f32.mrb[13].mxu0 }
0x1714   :  { %v4226_v8 = vpop.f32.mrb[14].mxu0 }
0x1715   :  { %v4228_v9 = vpop.f32.mrb[15].mxu0 }
0x1721   :  { %v3307_v10 = vpop.f32.mrb[16].mxu0 }
0x1722   :  { %v2100_v11 = vmul.f32 0.35355338, %v3307_v10  ;;  %v2090_v12 = vpop.f32.mrb[17].mxu0 }
0x1723   :  { %v2099_v14 = vmul.f32 0.35355338, %v2090_v12 }
0x1724   :  { %v2102_v52 = vadd.f32 %v2100_v11, %v3936_v15 }
0x1725   :  { %v2101_v20 = vadd.f32 %v2099_v14, %v3939_v17 }
0x1726   :  { %v2106_v21 = vsel %vm387_vm9, %v2102_v52, -inf }
0x1727   :  { %2107 = vmax.xlane.f32.xlu1 %v2106_v21  ;;  %v2103_v22 = vsel %vm387_vm9, %v2101_v20, -inf }
0x1728   :  { %2104 = vmax.xlane.f32.xlu0 %v2103_v22 }
0x1738   :  { %3645 = vrot.lane.b32.xlu1 %v4168_v56, %s3761_s2 }
0x173c   :  { %2212 = vrot.lane.b32.xlu1 %v4162_v58, %s3762_s3 }
0x1740   :  { %2214 = vrot.lane.b32.xlu1 %v4160_v32, %s3762_s3 }
0x17b4   :  { %v2108_v23 = vpop.xlane.xlu1 %2107 }
0x17b5   :  { %v2110_v24 = vsub.f32 %v2102_v52, %v2108_v23  ;;  %v2105_v25 = vpop.xlane.xlu0 %2104 }
0x17b6   :  { %v2109_v26 = vsub.f32 %v2101_v20, %v2105_v25 }
0x17b7   :  { %v2113_v27 = vmul.f32 1.442695, %v2110_v24 }
0x17b8   :  { %v2111_v61 = vmul.f32 1.442695, %v2109_v26  ;;  %v3646_v31 = vpop.permute.xlu1 %3645 }
0x17b9   :  { %3723 = vpow2.f32 %v2113_v27  ;;  %v3648_v33 = vunpack.i.h.bf16 %v3646_v31  ;;  %v3647_v60 = vunpack.i.l.bf16 %v3646_v31 }
0x17ba   :  { %3725 = vpow2.f32 %v2111_v61 }
0x17bb   :  { %v3507_v34 = vpack.c.bf16 %v3648_v33, %v3647_v60  ;;  %v2979_v33 = vld [vmem:[%s4390_s6 + $0x20] sm:$0xff]  ;;  %v2981_v60 = vld [vmem:[%s4390_s6 + $0x30] sm:$0xff] }
0x17bc   :  { %v2213_v50 = vpop.permute.xlu1 %2212 }
0x17bd   :  { %3508 = vmatprep.subr.bf16.mxu1 %v3507_v34 }
0x17be   :  { %3510 = vmatpush3.bf16.msra.mxu1 %v3507_v34 }
0x17c0   :  { %v2215_v37 = vpop.permute.xlu1 %2214 }
0x17c3   :  { %v3724_v35 = vpop.eup %3723 }
0x17c4   :  { %v2118_v58 = vsel %vm387_vm9, %v3724_v35, 0.0  ;;  %v3726_v38 = vpop.eup %3725 }
0x17c5   :  { %2119 = vadd.xlane.f32.xlu0 %v2118_v58  ;;  %v2115_v32 = vsel %vm387_vm9, %v3726_v38, 0.0 }
0x17c9   :  { %2116 = vadd.xlane.f32.xlu0 %v2115_v32 }
0x17df   :  { %3650 = vrot.lane.b32.xlu0 %v4168_v56, %s3763_s16 }
0x1852   :  { %v2120_v40 = vpop.xlane.xlu0 %2119 }
0x1853   :  { %3727 = vrcp.f32 %v2120_v40 }
0x1856   :  { %v2117_v41 = vpop.xlane.xlu0 %2116 }
0x1857   :  { %3729 = vrcp.f32 %v2117_v41 }
0x185a   :  { %v3651_v3 = vpop.permute.xlu0 %3650 }
0x185b   :  { %v3653_v36 = vunpack.i.h.bf16 %v3651_v3  ;;  %v3652_v42 = vunpack.i.l.bf16 %v3651_v3 }
0x185d   :  { %v3511_v43 = vpack.c.bf16 %v3653_v36, %v3652_v42  ;;  %v3728_v44 = vpop.eup %3727 }
0x185e   :  { %v2124_v49 = vmul.f32 %v3728_v44, %v3724_v35  ;;  %v2982_v35 = vld [vmem:[%s4390_s6 + $0x38] sm:$0xff] }
0x185f   :  { %3513 = vmatprep.subr.msk.bf16.mxu1 %vm3920_vm6, %v3511_v43  ;;  %v3525_v58 = vpack.c.bf16 %v2982_v35, %v2981_v60 }
0x1861   :  { %v3730_v47 = vpop.eup %3729 }
0x1862   :  { %v2123_v48 = vmul.f32 %v3730_v47, %v3726_v38 }
0x1864   :  { %3312 = vmatprep.mubr.msk.f32.mxu1 %vm387_vm9, %v2123_v48 }
0x1865   :  { %3313 = vmatmul.mubr.msk.f32.vlgmr.msra.gmra.mrb[20].mxu1 %vm387_vm9, %v2124_v49 }
0x1866   :  { %3516 = vmatpush3.bf16.xpose.msk.msra.mxu1 %vm3920_vm6, %v3511_v43  ;;  %3319 = vmatprep.mubr.msk.f32.mxu1 %vm189_vm5, %v2213_v50 }
0x186d   :  { %3320 = vmatmul.mubr.msk.f32.vlgmr.msra.gmra.mrb[22].mxu1 %vm189_vm5, %v2215_v37 }
0x1938   :  { %v3314_v51 = vpop.f32.mrb[20].mxu1 }
0x1939   :  { %v2203_v54 = vpop.f32.mrb[21].mxu1 }
0x1940   :  { %v3321_v55 = vpop.f32.mrb[22].mxu1 }
0x1941   :  { %v2304_v63 = vmul.f32 0.35355338, %v3321_v55  ;;  %v2294_v2 = vpop.f32.mrb[23].mxu1 }
0x1942   :  { %v2303_v1 = vmul.f32 0.35355338, %v2294_v2 }
0x1943   :  { %v2306_v62 = vadd.f32 %v2304_v63, %v3936_v15 }
0x1944   :  { %v2305_v57 = vadd.f32 %v2303_v1, %v3939_v17 }
0x1945   :  { %v2310_v0 = vsel %vm387_vm9, %v2306_v62, -inf }
0x1946   :  { %2311 = vmax.xlane.f32.xlu1 %v2310_v0  ;;  %v2307_v7 = vsel %vm387_vm9, %v2305_v57, -inf }
0x1947   :  { %2308 = vmax.xlane.f32.xlu0 %v2307_v7 }
0x1957   :  { %3655 = vrot.lane.b32.xlu1 %v4168_v56, %s3764_s17 }
0x195b   :  { %2420 = vrot.lane.b32.xlu1 %v4226_v8, %s3765_s18 }
0x195f   :  { %2426 = vrot.lane.b32.xlu1 %v2203_v54, %s3766_s19 }
0x19d3   :  { %v2312_v4 = vpop.xlane.xlu1 %2311 }
0x19d4   :  { %v2314_v10 = vsub.f32 %v2306_v62, %v2312_v4  ;;  %v2309_v11 = vpop.xlane.xlu0 %2308 }
0x19d5   :  { %v2313_v15 = vsub.f32 %v2305_v57, %v2309_v11 }
0x19d6   :  { %v2317_v12 = vmul.f32 1.442695, %v2314_v10 }
0x19d7   :  { %v2315_v17 = vmul.f32 1.442695, %v2313_v15  ;;  %v3656_v14 = vpop.permute.xlu1 %3655 }
0x19d8   :  { %v3658_v52 = vunpack.i.h.bf16 %v3656_v14  ;;  %v3657_v20 = vunpack.i.l.bf16 %v3656_v14 }
0x19d9   :  { %3731 = vpow2.f32 %v2315_v17  ;;  %v2986_v17 = vld [vmem:[%s4391_s7 + $0x28] sm:$0xff] }
0x19da   :  { %v3517_v21 = vpack.c.bf16 %v3658_v52, %v3657_v20  ;;  %3733 = vpow2.f32 %v2317_v12  ;;  %v2987_v52 = vld [vmem:[%s4391_s7 + $0x30] sm:$0xff]  ;;  %v2988_v20 = vld [vmem:[%s4391_s7 + $0x38] sm:$0xff] }
0x19db   :  { %v2421_v41 = vpop.permute.xlu1 %2420 }
0x19dc   :  { %3518 = vmatprep.subr.bf16.mxu0 %v3517_v21  ;;  %v2441_v44 = vsel %vm189_vm5, %v4222_v5, %v2421_v41 }
0x19dd   :  { %3520 = vmatpush3.bf16.msra.mxu0 %v3517_v21  ;;  %v3533_v21 = vpack.c.bf16 %v2988_v20, %v2987_v52 }
0x19df   :  { %v2427_v36 = vpop.permute.xlu1 %2426 }
0x19e3   :  { %v3732_v56 = vpop.eup %3731 }
0x19e4   :  { %v2319_v22 = vsel %vm387_vm9, %v3732_v56, 0.0  ;;  %v3734_v8 = vpop.eup %3733 }
0x19e5   :  { %2320 = vadd.xlane.f32.xlu0 %v2319_v22  ;;  %v2322_v23 = vsel %vm387_vm9, %v3734_v8, 0.0 }
0x19e9   :  { %2323 = vadd.xlane.f32.xlu0 %v2322_v23 }
0x19ff   :  { %2418 = vrot.lane.b32.xlu0 %v4228_v9, %s3765_s18  ;;  %v2980_v9 = vld [vmem:[%s4390_s6 + $0x28] sm:$0xff] }
0x1a00   :  { %v3521_v34 = vpack.c.bf16 %v2980_v9, %v2979_v33  ;;  %v2573_v9 = vrot.slane %v4156_v30, %v1265_v46  ;;  %v2993_v46 = vld [vmem:[%s4392_s8 + $0x50] sm:$0xff] }
0x1a02   :  { %3522 = vmatprep.subr.bf16.mxu0 %v3521_v34 }
0x1a03   :  { %2428 = vrot.lane.b32.xlu0 %v3314_v51, %s3766_s19 }
0x1a72   :  { %v2321_v24 = vpop.xlane.xlu0 %2320 }
0x1a73   :  { %3735 = vrcp.f32 %v2321_v24 }
0x1a76   :  { %v2324_v25 = vpop.xlane.xlu0 %2323 }
0x1a77   :  { %3737 = vrcp.f32 %v2324_v25 }
0x1a7a   :  { %v2419_v40 = vpop.permute.xlu0 %2418 }
0x1a7b   :  { %v2440_v42 = vsel %vm189_vm5, %v4224_v6, %v2419_v40  ;;  %v2454_v6 = vrot.slane %v4156_v30, %v1146_v53  ;;  %v2994_v40 = vld [vmem:[%s4392_s8 + $0x58] sm:$0xff] }
0x1a7c   :  { %v2442_v48 = vsel %vm387_vm9, %v2440_v42, %v2427_v36  ;;  %v3541_v41 = vpack.c.bf16 %v2994_v40, %v2993_v46  ;;  %v2996_v36 = vld [vmem:[%s4392_s8 + $0x68] sm:$0xff] }
0x1a7d   :  { %v3736_v26 = vpop.eup %3735 }
0x1a7e   :  { %v2327_v27 = vmul.f32 %v3736_v26, %v3732_v56  ;;  %v2429_v3 = vpop.permute.xlu0 %2428  ;;  %v2567_v26 = vrot.slane %v4156_v30, %v1259_v45  ;;  %v2991_v45 = vld [vmem:[%s4392_s8 + $0x40] sm:$0xff] }
0x1a7f   :  { %v2443_v49 = vsel %vm387_vm9, %v2441_v44, %v2429_v3  ;;  %v2995_v3 = vld [vmem:[%s4392_s8 + $0x60] sm:$0xff]  ;;  %v2998_v44 = vld [vmem:[%s4392_s8 + $0x78] sm:$0xff] }
0x1a80   :  { %3326 = vmatprep.mubr.msk.f32.mxu0 %vm387_vm9, %v2327_v27  ;;  %v3545_v42 = vpack.c.bf16 %v2996_v36, %v2995_v3 }
0x1a81   :  { %v3738_v61 = vpop.eup %3737 }
0x1a82   :  { %v2328_v31 = vmul.f32 %v3738_v61, %v3734_v8 }
0x1a84   :  { %3327 = vmatmul.mubr.msk.f32.vlgmr.msra.gmra.mrb[18].mxu0 %vm387_vm9, %v2328_v31 }
0x1a85   :  { %3524 = vmatpush3.bf16.msra.mxu0 %v3521_v34 }
0x1a86   :  { %3526 = vmatprep.subr.bf16.mxu0 %v3525_v58 }
0x1a89   :  { %3528 = vmatpush3.bf16.msra.mxu0 %v3525_v58 }
0x1b57   :  { %v3328_v38 = vpop.f32.mrb[18].mxu0 }
0x1b58   :  { %2436 = vrot.lane.b32.xlu0 %v3328_v38, %s3767_s27  ;;  %v2407_v32 = vpop.f32.mrb[19].mxu0  ;;  %v2992_v38 = vld [vmem:[%s4392_s8 + $0x48] sm:$0xff] }
0x1b59   :  { %2434 = vrot.lane.b32.xlu1 %v2407_v32, %s3767_s27  ;;  %v3537_v32 = vpack.c.bf16 %v2992_v38, %v2991_v45  ;;  %v2826_v45 = vld [vmem:[%s4393_s10 + $0x18] sm:$0xff] }
0x1b5b   :  { %3538 = vmatprep.subr.bf16.mxu0 %v3537_v32 }
0x1bca   :  { %v2437_v43 = vpop.permute.xlu0 %2436 }
0x1bcb   :  { %v2435_v47 = vpop.permute.xlu1 %2434  ;;  %v2445_v37 = vsel %vm1137_vm10, %v2443_v49, %v2437_v43  ;;  %v2997_v43 = vld [vmem:[%s4392_s8 + $0x70] sm:$0xff] }
0x1bcc   :  { %v2444_v50 = vsel %vm1137_vm10, %v2442_v48, %v2435_v47  ;;  %v3549_v47 = vpack.c.bf16 %v2998_v44, %v2997_v43  ;;  %v2584_v48 = vrot.slane %v4156_v30, %v1275_v13 }
0x1bcd   :  { %3337 = vmatprep.mubr.msk.f32.mxu0 %vm148_vm4, %v2444_v50 }
0x1bce   :  { %3338 = vmatmul.mubr.msk.f32.vlgmr.msra.gmra.mrb[20].mxu0 %vm148_vm4, %v2445_v37 }
0x1bcf   :  { %3540 = vmatpush3.bf16.msra.mxu0 %v3537_v32 }
0x1bd0   :  { %3542 = vmatprep.subr.bf16.mxu0 %v3541_v41 }
0x1bd3   :  { %3544 = vmatpush3.bf16.msra.mxu0 %v3541_v41 }
0x1bd4   :  { %3546 = vmatprep.subr.bf16.mxu0 %v3545_v42 }
0x1bd7   :  { %3548 = vmatpush3.bf16.msra.mxu0 %v3545_v42  ;;  %v2809_v42 = vrot.slane %v4156_v30, %v1500_v18  ;;  %v3001_v18 = vld [vmem:[%s4393_s10 + $0x20] ss:$0 sm:$0xff] }
0x1bd8   :  { %3550 = vmatprep.subr.bf16.mxu0 %v3549_v47 }
0x1bdb   :  { %3552 = vmatpush3.bf16.msra.mxu0 %v3549_v47 }
0x1ca1   :  { %v3339_v51 = vpop.f32.mrb[20].mxu0 }
0x1ca2   :  { %v2533_v54 = vadd.f32 %v3339_v51, %v2454_v6  ;;  %v2527_v5 = vpop.f32.mrb[21].mxu0 }
0x1ca3   :  { %v2528_v55 = vadd.f32 %v2527_v5, %v2454_v6 }
0x1ca4   :  { %v2537_v63 = vadd.f32 %v2533_v54, %v4147_v29 }
0x1ca5   :  { %v2536_v2 = vadd.f32 %v2528_v55, %v4145_v28  ;;  %v2985_v28 = vld [vmem:[%s4391_s7 + $0x20] sm:$0xff] }
0x1ca6   :  { %v2541_v1 = vsel %vm148_vm4, %v2537_v63, 0.0  ;;  %v3529_v14 = vpack.c.bf16 %v2986_v17, %v2985_v28 }
0x1ca7   :  { %2542 = vadd.xlane.f32.xlu0 %v2541_v1  ;;  %v2538_v62 = vsel %vm148_vm4, %v2536_v2, 0.0 }
0x1ca8   :  { %2539 = vadd.xlane.f32.xlu1 %v2538_v62  ;;  %3530 = vmatprep.subr.bf16.mxu1 %v3529_v14 }
0x1ca9   :  { %3532 = vmatpush3.bf16.msra.mxu1 %v3529_v14 }
0x1caa   :  { %3534 = vmatprep.subr.bf16.mxu1 %v3533_v21 }
0x1cad   :  { %3536 = vmatpush3.bf16.msra.mxu1 %v3533_v21 }
0x1d34   :  { %v2543_v57 = vpop.xlane.xlu0 %2542 }
0x1d35   :  { %v2545_v0 = vmul.f32 0.03125, %v2543_v57  ;;  %v2540_v7 = vpop.xlane.xlu1 %2539 }
0x1d36   :  { %v2544_v4 = vmul.f32 0.03125, %v2540_v7 }
0x1d37   :  { %v2547_v10 = vsub.f32 %v2537_v63, %v2545_v0 }
0x1d38   :  { %v2546_v53 = vsub.f32 %v2536_v2, %v2544_v4 }
0x1d39   :  { %v2549_v11 = vmul.f32 %v2547_v10, %v2547_v10 }
0x1d3a   :  { %v2548_v15 = vmul.f32 %v2546_v53, %v2546_v53 }
0x1d3b   :  { %v2553_v12 = vsel %vm148_vm4, %v2549_v11, 0.0 }
0x1d3c   :  { %2554 = vadd.xlane.f32.xlu1 %v2553_v12  ;;  %v2550_v29 = vsel %vm148_vm4, %v2548_v15, 0.0 }
0x1d3d   :  { %2551 = vadd.xlane.f32.xlu0 %v2550_v29  ;;  %v2696_v29 = vrot.slane %v4156_v30, %v1386_v39 }
0x1dc9   :  { %v2555_v56 = vpop.xlane.xlu1 %2554 }
0x1dca   :  { %v2557_v22 = vmul.f32 0.03125, %v2555_v56  ;;  %v2552_v8 = vpop.xlane.xlu0 %2551 }
0x1dcb   :  { %v2556_v23 = vmul.f32 0.03125, %v2552_v8 }
0x1dcc   :  { %v2559_v24 = vadd.f32 1e-12, %v2557_v22 }
0x1dcd   :  { %v2558_v25 = vadd.f32 1e-12, %v2556_v23 }
0x1dce   :  { %3739 = vrsqrt.f32 %v2559_v24 }
0x1dcf   :  { %3741 = vrsqrt.f32 %v2558_v25 }
0x1dd8   :  { %v3740_v27 = vpop.eup %3739 }
0x1dd9   :  { %v3742_v61 = vpop.eup %3741  ;;  %v2563_v31 = vmul.f32 %v3740_v27, %v2547_v10 }
0x1dda   :  { %v2562_v33 = vmul.f32 %v3742_v61, %v2546_v53 }
0x1ddb   :  { %v2569_v60 = vmul.f32 %v2567_v26, %v2563_v31 }
0x1ddc   :  { %v2568_v34 = vmul.f32 %v2567_v26, %v2562_v33 }
0x1ddd   :  { %v2575_v58 = vadd.f32 %v2573_v9, %v2569_v60  ;;  %v2824_v60 = vld [vmem:[%s4393_s10 + $0x8] sm:$0xff] }
0x1dde   :  { %v2574_v35 = vadd.f32 %v2573_v9, %v2568_v34  ;;  %v2823_v9 = vld [vmem:[%s4393_s10] sm:$0xff] }
0x1ddf   :  { %v3554_v34 = vpack.c.bf16 %v2824_v60, %v2823_v9 }
0x1de0   :  { %3348 = vmatprep.mubr.msk.f32.mxu1 %vm148_vm4, %v2574_v35 }
0x1de1   :  { %3349 = vmatmul.mubr.msk.f32.vlgmr.msra.gmra.mrb[24].mxu1 %vm148_vm4, %v2575_v58 }
0x1de2   :  { %3378 = vmatprep.mubr.msk.f32.mxu1 %vm3769_vm12, %v3752_v16  ;;  %v2815_v16 = vrot.slane %v4156_v30, %v1506_v19 }
0x1eb4   :  { %v3350_v49 = vpop.f32.mrb[24].mxu1 }
0x1eb5   :  { %v2663_v50 = vadd.f32 %v3350_v49, %v2584_v48  ;;  %v2657_v37 = vpop.f32.mrb[25].mxu1 }
0x1eb6   :  { %v2658_v6 = vadd.f32 %v2657_v37, %v2584_v48 }
0x1eb7   :  { %v2667_v51 = vmul.f32 %v2663_v50, %v2663_v50 }
0x1eb8   :  { %v2666_v54 = vmul.f32 %v2658_v6, %v2658_v6 }
0x1eb9   :  { %v2669_v5 = vmul.f32 %v2667_v51, %v2663_v50 }
0x1eba   :  { %v2668_v55 = vmul.f32 %v2666_v54, %v2658_v6 }
0x1ebb   :  { %v2671_v63 = vmul.f32 0.044715, %v2669_v5 }
0x1ebc   :  { %v2670_v2 = vmul.f32 0.044715, %v2668_v55 }
0x1ebd   :  { %v2673_v1 = vadd.f32 %v2671_v63, %v2663_v50 }
0x1ebe   :  { %v2672_v62 = vadd.f32 %v2670_v2, %v2658_v6 }
0x1ebf   :  { %v2675_v57 = vmul.f32 0.7978846, %v2673_v1 }
0x1ec0   :  { %v2674_v0 = vmul.f32 0.7978846, %v2672_v62 }
0x1ec1   :  { %3743 = vtanh.f32 %v2675_v57 }
0x1ec2   :  { %3745 = vtanh.f32 %v2674_v0 }
0x1ecb   :  { %v3744_v7 = vpop.eup %3743 }
0x1ecc   :  { %v3746_v4 = vpop.eup %3745  ;;  %v2679_v10 = vadd.f32 1.0, %v3744_v7 }
0x1ecd   :  { %v2678_v13 = vadd.f32 1.0, %v3746_v4 }
0x1ece   :  { %v2681_v53 = vmul.f32 0.5, %v2679_v10 }
0x1ecf   :  { %v2680_v11 = vmul.f32 0.5, %v2678_v13 }
0x1ed0   :  { %v2683_v12 = vmul.f32 %v2681_v53, %v2663_v50 }
0x1ed1   :  { %v2682_v15 = vmul.f32 %v2680_v11, %v2658_v6 }
0x1ed3   :  { %3367 = vmatprep.mubr.msk.f32.mxu0 %vm1388_vm11, %v2682_v15 }
0x1ed4   :  { %3368 = vmatmul.mubr.msk.f32.vlgmr.msra.gmra.mrb[22].mxu0 %vm1388_vm11, %v2683_v12 }
0x1fa7   :  { %v3369_v28 = vpop.f32.mrb[22].mxu0 }
0x1fa8   :  { %v2775_v17 = vadd.f32 %v3369_v28, %v2696_v29  ;;  %v2769_v14 = vpop.f32.mrb[23].mxu0 }
0x1fa9   :  { %v2770_v52 = vadd.f32 %v2769_v14, %v2696_v29 }
0x1faa   :  { %v2779_v20 = vadd.f32 %v2775_v17, %v2575_v58  ;;  %v2825_v58 = vld [vmem:[%s4393_s10 + $0x10] sm:$0xff] }
0x1fab   :  { %v2778_v21 = vadd.f32 %v2770_v52, %v2574_v35  ;;  %v3768_v35 = vmov 0.0|0.0   ;;  %v3557_v38 = vpack.c.bf16 %v2826_v45, %v2825_v58 }
0x1fac   :  { %v2783_v56 = vsel %vm148_vm4, %v2779_v20, 0.0  ;;  %3553 = vmatprep.subr.bf16.mxu1 %v3768_v35 }
0x1fad   :  { %2784 = vadd.xlane.f32.xlu0 %v2783_v56  ;;  %v2780_v22 = vsel %vm148_vm4, %v2778_v21, 0.0  ;;  %3555 = vmatpush3.bf16.msra.mxu1 %v3554_v34 }
0x1fae   :  { %2781 = vadd.xlane.f32.xlu1 %v2780_v22  ;;  %3556 = vmatprep.subr.bf16.mxu1 %v3768_v35 }
0x1fb1   :  { %3558 = vmatpush3.bf16.msra.mxu1 %v3557_v38 }
0x203a   :  { %v2785_v8 = vpop.xlane.xlu0 %2784 }
0x203b   :  { %v2787_v23 = vmul.f32 0.03125, %v2785_v8  ;;  %v2782_v24 = vpop.xlane.xlu1 %2781 }
0x203c   :  { %v2786_v25 = vmul.f32 0.03125, %v2782_v24 }
0x203d   :  { %v2789_v26 = vsub.f32 %v2779_v20, %v2787_v23 }
0x203e   :  { %v2788_v27 = vsub.f32 %v2778_v21, %v2786_v25 }
0x203f   :  { %v2791_v61 = vmul.f32 %v2789_v26, %v2789_v26 }
0x2040   :  { %v2790_v39 = vmul.f32 %v2788_v27, %v2788_v27 }
0x2041   :  { %v2795_v31 = vsel %vm148_vm4, %v2791_v61, 0.0 }
0x2042   :  { %2796 = vadd.xlane.f32.xlu0 %v2795_v31  ;;  %v2792_v33 = vsel %vm148_vm4, %v2790_v39, 0.0 }
0x2043   :  { %2793 = vadd.xlane.f32.xlu1 %v2792_v33 }
0x20cf   :  { %v2797_v32 = vpop.xlane.xlu0 %2796 }
0x20d0   :  { %v2799_v46 = vmul.f32 0.03125, %v2797_v32  ;;  %v2794_v40 = vpop.xlane.xlu1 %2793 }
0x20d1   :  { %v2798_v41 = vmul.f32 0.03125, %v2794_v40 }
0x20d2   :  { %v2801_v3 = vadd.f32 1e-12, %v2799_v46 }
0x20d3   :  { %v2800_v36 = vadd.f32 1e-12, %v2798_v41 }
0x20d4   :  { %3747 = vrsqrt.f32 %v2801_v3 }
0x20d5   :  { %3749 = vrsqrt.f32 %v2800_v36 }
0x20de   :  { %v3748_v43 = vpop.eup %3747 }
0x20df   :  { %v3750_v44 = vpop.eup %3749  ;;  %v2805_v47 = vmul.f32 %v3748_v43, %v2789_v26 }
0x20e0   :  { %v2804_v48 = vmul.f32 %v3750_v44, %v2788_v27 }
0x20e1   :  { %v2811_v49 = vmul.f32 %v2809_v42, %v2805_v47 }
0x20e2   :  { %v2810_v50 = vmul.f32 %v2809_v42, %v2804_v48 }
0x20e3   :  { %v2817_v37 = vadd.f32 %v2815_v16, %v2811_v49 }
0x20e4   :  { %v2816_v6 = vadd.f32 %v2815_v16, %v2810_v50 }
0x20e5   :  { %v2819_v51 = vrot.slane %v2817_v37, 7 }
0x20e7   :  { %v2822_v54 = vsel %vm2821_vm13, %v2816_v6, %v2819_v51 }
0x20e8   :  { %3379 = vmatmul.mubr.msk.f32.vlgmr.msra.gmra.mrb[26].mxu1 %vm148_vm4, %v2822_v54 }
0x21bb   :  { %v2901_v5 = vpop.f32.mrb[26].mxu1 }
0x21bc   :  { %v2902_v55 = vadd.f32 %v3001_v18, %v2901_v5  ;;  %v3380_v59 = vpop.f32.mrb[27].mxu1 }
0x21be   :  { %2906 = vst.msk [vmem:[%s4394_s11] sm:$0x3] %vm2905_vm14, %v2902_v55 }

</bundles_post_ra>
